<compile_context>
chip_gen: v5e
topology: v5e:2x2
jax: 0.10.0
libtpu: 0.0.40
codegen_flags: <defaults>
</compile_context>

<pallas_src>
import functools

import jax
import jax.numpy as jnp
from jax import lax
from jax.experimental import pallas as pl
from jax.experimental.pallas import tpu as pltpu

COMPUTE_DTYPE = jnp.bfloat16
VMEM_LIMIT = 48 * 1024 * 1024


def _round_up(x, m):
    return (x + m - 1) // m * m


# ----------------------------------------------------------------------------
# Pallas kernel: fused direct convolution (tap-accumulated matmuls)
#   x_ref : (M_in, Cin)   flattened, halo-padded activation (one image)
#   w_ref : (kh*kw*Cin, TN) weights with BN scale pre-folded (bf16)
#   b_ref : (1, TN)        f32 bias (BN shift folded)
#   r_ref : (Mp, TN)       optional residual (fused add)
#   o_ref : (Mp, TN)       output tile
# ----------------------------------------------------------------------------
def _conv_tap_kernel(x_ref, w_ref, b_ref, *rest, kh, kw, width, cin, m_rows,
                     act, res_mode):
    if res_mode is not None:
        r_ref, o_ref = rest
    else:
        (o_ref,) = rest

    n_out = o_ref.shape[-1]
    pw = (kw - 1) // 2
    acc = jnp.zeros((m_rows, n_out), jnp.float32)

    col = None
    if kw > 1:
        # column index of each flattened output pixel (hoisted out of the taps)
        col = lax.broadcasted_iota(jnp.int32, (m_rows, 1), 0) % width

    for di in range(kh):
        for dj in range(kw):
            tap = di * kw + dj
            patch = x_ref[pl.ds(di * width + dj, m_rows), :]       # (Mp, Cin)
            w_tap = w_ref[pl.ds(tap * cin, cin), :]                # (Cin, TN)
            contrib = jnp.dot(patch, w_tap,
                              preferred_element_type=jnp.float32)
            shift = dj - pw
            if shift != 0:
                # zero the columns whose horizontal neighbour is out of range
                # (those reads wrapped to the adjacent image row).
                src = col + shift
                valid = jnp.logical_and(src >= 0, src < width)
                contrib = jnp.where(valid, contrib, 0.0)
            acc = acc + contrib

    y = acc + b_ref[...].astype(jnp.float32)
    if res_mode == "add_then_act":
        y = y + r_ref[...].astype(jnp.float32)
    if act == "relu":
        y = jnp.maximum(y, 0.0)
    elif act == "sigmoid":
        y = jax.nn.sigmoid(y)
    if res_mode == "act_then_add":
        y = y + r_ref[...].astype(jnp.float32)
    o_ref[...] = y.astype(o_ref.dtype)


# ----------------------------------------------------------------------------
# Convolution wrapper around the Pallas kernel.
# ----------------------------------------------------------------------------
def conv2d(x, cp, act=None, res=None, res_mode=None, out_dtype=None):
    """Direct NHWC conv.  cp: dict(w2d, b, kh, kw) with BN folded into w2d."""
    B, H, W, cin = x.shape
    kh, kw = cp['kh'], cp['kw']
    k_rows, cout = cp['w2d'].shape
    assert k_rows == kh * kw * cin, (k_rows, kh, kw, cin)

    M = H * W
    Mp = _round_up(M, 8)                       # sublane-friendly row count
    halo = ((kh - 1) // 2) * W + (kw - 1) // 2
    lead, trail = halo, halo + (Mp - M)
    xf = x.reshape(B, M, cin).astype(COMPUTE_DTYPE)
    if lead or trail:
        xf = jnp.pad(xf, ((0, 0), (lead, trail), (0, 0)))
    M_in = M + lead + trail

    TN = 256 if (cout > 256 and cout % 256 == 0) else cout
    grid = (B, cout // TN)

    in_specs = [
        pl.BlockSpec((None, M_in, cin), lambda b, j: (b, 0, 0)),
        pl.BlockSpec((k_rows, TN), lambda b, j: (0, j)),
        pl.BlockSpec((1, TN), lambda b, j: (0, j)),
    ]
    operands = [xf, cp['w2d'], cp['b']]

    if res is not None:
        rf = res.reshape(B, M, cout).astype(COMPUTE_DTYPE)
        if Mp != M:
            rf = jnp.pad(rf, ((0, 0), (0, Mp - M), (0, 0)))
        operands.append(rf)
        in_specs.append(pl.BlockSpec((None, Mp, TN), lambda b, j: (b, 0, j)))
    else:
        res_mode = None

    kernel = functools.partial(
        _conv_tap_kernel, kh=kh, kw=kw, width=W, cin=cin, m_rows=Mp,
        act=act, res_mode=res_mode)

    out = pl.pallas_call(
        kernel,
        out_shape=jax.ShapeDtypeStruct(
            (B, Mp, cout), COMPUTE_DTYPE if out_dtype is None else out_dtype),
        grid=grid,
        in_specs=in_specs,
        out_specs=pl.BlockSpec((None, Mp, TN), lambda b, j: (b, 0, j)),
        compiler_params=pltpu.CompilerParams(
            dimension_semantics=("parallel", "parallel"),
            vmem_limit_bytes=VMEM_LIMIT),
    )(*operands)

    if Mp != M:
        out = out[:, :M, :]
    return out.reshape(B, H, W, cout)


def im2col(x, k, pad):
    """Patch extraction for the tiny-Cin 7x7 stem only (Cin=3 -> 147)."""
    B, H, W, C = x.shape
    xp = jnp.pad(x, ((0, 0), (pad, pad), (pad, pad), (0, 0)))
    return jnp.concatenate(
        [xp[:, i:i + H, j:j + W, :] for i in range(k) for j in range(k)],
        axis=-1)


# ----------------------------------------------------------------------------
# Plain-JAX glue ops (pool / unpool / upsample / fusion mask)
# ----------------------------------------------------------------------------
def max_pool2x2_with_indices(x):
    B, H, W, C = x.shape
    xr = x.reshape(B, H // 2, 2, W // 2, 2, C)
    xr = xr.transpose(0, 1, 3, 5, 2, 4).reshape(B, H // 2, W // 2, C, 4)
    idx = jnp.argmax(xr, axis=-1)
    val = jnp.max(xr, axis=-1)
    return val, idx


def max_unpool2x2(x, idx):
    B, Hh, Wh, C = x.shape
    zero = jnp.zeros((), x.dtype)
    pieces = [jnp.where(idx == k, x, zero) for k in range(4)]
    y = jnp.stack(pieces, axis=-1)                       # (B,Hh,Wh,C,4)
    y = y.reshape(B, Hh, Wh, C, 2, 2).transpose(0, 1, 4, 2, 5, 3)
    return y.reshape(B, Hh * 2, Wh * 2, C)


def max_pool_k2(x, stride):
    slices = [x[:, di::stride, dj::stride, :]
              for di in range(2) for dj in range(2)]
    return jnp.max(jnp.stack(slices, axis=0), axis=0)


def upsample_bilinear(x, factor):
    B, H, W, C = x.shape
    return jax.image.resize(x, (B, H * factor, W * factor, C),
                            method='bilinear')


def get_masked_local_from_global(global_sig, local_sig):
    index = jnp.argmax(global_sig, axis=-1)[..., None].astype(jnp.float32)
    trimap_mask = jnp.where(index == 2.0, 0.0, index)
    fg_mask = jnp.where(index == 1.0, 0.0, index)
    fg_mask = jnp.where(fg_mask == 2.0, 1.0, fg_mask)
    return local_sig * trimap_mask + fg_mask


# ----------------------------------------------------------------------------
# Deterministic synthetic parameters (BatchNorm represented as scale/bias)
# ----------------------------------------------------------------------------
class ParamFactory:
    def __init__(self, seed=42):
        self.base = jax.random.PRNGKey(seed)
        self.count = 0

    def key(self):
        k = jax.random.fold_in(self.base, self.count)
        self.count += 1
        return k

    def conv_bn(self, kh, kw, cin, cout):
        fan_in = kh * kw * cin
        w = jax.random.normal(self.key(), (kh, kw, cin, cout),
                              jnp.float32) / jnp.sqrt(float(fan_in))
        scale = 1.0 + 0.05 * jax.random.normal(self.key(), (cout,), jnp.float32)
        bias = 0.05 * jax.random.normal(self.key(), (cout,), jnp.float32)
        return dict(w=w, scale=scale, bias=bias)

    def conv(self, kh, kw, cin, cout, bias=True):
        fan_in = kh * kw * cin
        w = jax.random.normal(self.key(), (kh, kw, cin, cout),
                              jnp.float32) / jnp.sqrt(float(fan_in))
        b = (0.05 * jax.random.normal(self.key(), (cout,), jnp.float32)
             if bias else jnp.zeros((cout,), jnp.float32))
        return dict(w=w, scale=jnp.ones((cout,), jnp.float32), bias=b)


def init_params(pf):
    P = {}
    # resnet34_mp encoder (all strides 1, downsampling via indexed maxpools)
    P['conv1'] = pf.conv_bn(7, 7, 3, 64)

    def make_layer(cin, planes, nblocks):
        blocks = []
        for b in range(nblocks):
            inp = cin if b == 0 else planes
            blk = dict(conv1=pf.conv_bn(3, 3, inp, planes),
                       conv2=pf.conv_bn(3, 3, planes, planes))
            if b == 0 and inp != planes:
                blk['down'] = pf.conv_bn(1, 1, inp, planes)
            blocks.append(blk)
        return blocks

    P['layer1'] = make_layer(64, 64, 3)
    P['layer2'] = make_layer(64, 128, 4)
    P['layer3'] = make_layer(128, 256, 6)
    P['layer4'] = make_layer(256, 512, 3)

    def tfi(planes):
        mid = planes // 2
        return dict(transform=pf.conv(1, 1, planes, mid, bias=False),
                    conv1=pf.conv_bn(3, 3, mid * 3, planes))

    P['tfi_3'] = tfi(256)
    P['tfi_2'] = tfi(128)
    P['tfi_1'] = tfi(64)
    P['tfi_0'] = tfi(64)

    def sbfi(planes, planes2, stride):
        return dict(t1=pf.conv(1, 1, planes, planes // 2, bias=False),
                    t2=pf.conv(1, 1, planes2, planes // 2, bias=False),
                    conv1=pf.conv_bn(3, 3, planes, planes),
                    stride=stride)

    P['sbfi_2'] = sbfi(128, 64, 8)
    P['sbfi_1'] = sbfi(64, 64, 4)
    P['sbfi_0'] = sbfi(64, 64, 2)

    def dbfi(planes, planes2, stride):
        return dict(t1=pf.conv(1, 1, planes, planes // 2, bias=False),
                    t2=pf.conv(1, 1, planes2, planes // 2, bias=False),
                    conv1=pf.conv_bn(3, 3, planes, planes),
                    conv2=pf.conv(3, 3, planes, 3, bias=False),
                    stride=stride)

    P['dbfi_2'] = dbfi(128, 512, 4)
    P['dbfi_1'] = dbfi(64, 512, 8)
    P['dbfi_0'] = dbfi(64, 512, 16)

    def dec(channels, last_plain=False):
        layers = []
        for idx in range(len(channels) - 1):
            cin, cout = channels[idx], channels[idx + 1]
            if last_plain and idx == len(channels) - 2:
                layers.append((pf.conv(3, 3, cin, cout, bias=True), False))
            else:
                layers.append((pf.conv_bn(3, 3, cin, cout), True))
        return layers

    P['decoder4_g'] = dec([512, 512, 512, 256])
    P['decoder3_g'] = dec([256, 256, 256, 128])
    P['decoder2_g'] = dec([128, 128, 128, 64])
    P['decoder1_g'] = dec([64, 64, 64, 64])
    P['decoder0_g'] = dec([64, 64, 64, 3], last_plain=True)
    P['decoder4_l'] = dec([512, 512, 512, 256])
    P['decoder3_l'] = dec([256, 256, 256, 128])
    P['decoder2_l'] = dec([128, 128, 128, 64])
    P['decoder1_l'] = dec([64, 64, 64, 64])
    P['decoder0_l'] = dec([64, 64, 64])
    P['decoder_final_l'] = pf.conv(3, 3, 64, 1, bias=True)
    return P


# ----------------------------------------------------------------------------
# Parameter preparation: fold BN scale into the weight columns, reshape to the
# 2D (kh*kw*Cin, Cout) slab the kernel consumes, cast to bf16.
# ----------------------------------------------------------------------------
def _prep_conv(p):
    kh, kw, cin, cout = p['w'].shape
    w2d = (p['w'] * p['scale']).reshape(kh * kw * cin, cout)
    return dict(w2d=w2d.astype(COMPUTE_DTYPE),
                b=p['bias'].reshape(1, cout).astype(jnp.float32),
                kh=kh, kw=kw)


def prepare_params(P):
    def walk(node):
        if isinstance(node, dict):
            if 'w' in node and 'scale' in node:
                return _prep_conv(node)
            return {k: walk(v) for k, v in node.items()}
        if isinstance(node, (list, tuple)):
            return type(node)(walk(v) for v in node)
        return node

    Q = walk(P)
    # The 7x7 stem is consumed as pre-extracted 49*3-channel patches, so it
    # runs through the kernel as a 1x1 conv with Cin = 147.
    Q['conv1'] = dict(Q['conv1'], kh=1, kw=1)
    return Q


# ----------------------------------------------------------------------------
# Sub-module forward passes
# ----------------------------------------------------------------------------
def basic_block(x, blk):
    out = conv2d(x, blk['conv1'], act='relu')
    ident = conv2d(x, blk['down']) if 'down' in blk else x
    # residual add + final ReLU fused into the second conv's epilogue
    return conv2d(out, blk['conv2'], act='relu',
                  res=ident, res_mode='add_then_act')


def run_layer(x, blocks):
    for blk in blocks:
        x = basic_block(x, blk)
    return x


def run_decoder(x, layers, upsample=1):
    for cp, relu in layers:
        x = conv2d(x, cp, act='relu' if relu else None)
    if upsample > 1:
        x = upsample_bilinear(x, upsample)
    return x


def tfi_forward(p, s_guid, m_dec, m_enc):
    a = conv2d(s_guid, p['transform'])
    b = conv2d(m_dec, p['transform'])
    c = conv2d(m_enc, p['transform'])
    x = jnp.concatenate([a, b, c], axis=-1)
    return conv2d(x, p['conv1'], act='relu')


def sbfi_forward(p, m_dec, e0):
    a = conv2d(m_dec, p['t1'])
    e0_mp = max_pool_k2(e0, p['stride'])
    b = conv2d(e0_mp, p['t2'])
    x = jnp.concatenate([a, b], axis=-1)
    # relu(conv(x)) + m_dec fused into the conv epilogue
    return conv2d(x, p['conv1'], act='relu', res=m_dec, res_mode='act_then_add')


def dbfi_forward(p, s_dec, e4):
    a = conv2d(s_dec, p['t1'])
    b = conv2d(e4, p['t2'])
    b = upsample_bilinear(b, p['stride'])
    x = jnp.concatenate([a, b], axis=-1)
    out = conv2d(x, p['conv1'], act='relu', res=s_dec, res_mode='act_then_add')
    out_side = conv2d(out, p['conv2'], out_dtype=jnp.float32)
    out_side = upsample_bilinear(out_side, 32 // p['stride'])
    return out, out_side


# ----------------------------------------------------------------------------
# Full P3mNet forward
# ----------------------------------------------------------------------------
def p3mnet_forward(P, x_nchw):
    x = jnp.transpose(x_nchw, (0, 2, 3, 1))                      # NCHW -> NHWC

    # encoder
    e0 = conv2d(im2col(x, 7, 3), P['conv1'], act='relu')
    e0p, id0 = max_pool2x2_with_indices(e0)
    e1p, id1 = max_pool2x2_with_indices(e0p)
    e1 = run_layer(e1p, P['layer1'])
    e2p, id2 = max_pool2x2_with_indices(e1)
    e2 = run_layer(e2p, P['layer2'])
    e3p, id3 = max_pool2x2_with_indices(e2)
    e3 = run_layer(e3p, P['layer3'])
    e4p, id4 = max_pool2x2_with_indices(e3)
    e4 = run_layer(e4p, P['layer4'])

    # global (semantic) decoder
    d4_g = run_decoder(e4, P['decoder4_g'], upsample=2)
    d3_g = run_decoder(d4_g, P['decoder3_g'], upsample=2)
    d2_g, side2 = dbfi_forward(P['dbfi_2'], d3_g, e4)
    d2_g = run_decoder(d2_g, P['decoder2_g'], upsample=2)
    d1_g, side1 = dbfi_forward(P['dbfi_1'], d2_g, e4)
    d1_g = run_decoder(d1_g, P['decoder1_g'], upsample=2)
    d0_g, side0 = dbfi_forward(P['dbfi_0'], d1_g, e4)
    d0_g = run_decoder(d0_g, P['decoder0_g'], upsample=2)
    global_sigmoid = d0_g.astype(jnp.float32)

    # local (matting) decoder
    d4_l = run_decoder(e4, P['decoder4_l'])
    d4_l = max_unpool2x2(d4_l, id4)
    d3_l = tfi_forward(P['tfi_3'], d4_g, d4_l, e3)
    d3_l = run_decoder(d3_l, P['decoder3_l'])
    d3_l = max_unpool2x2(d3_l, id3)
    d2_l = tfi_forward(P['tfi_2'], d3_g, d3_l, e2)
    d2_l = sbfi_forward(P['sbfi_2'], d2_l, e0)
    d2_l = run_decoder(d2_l, P['decoder2_l'])
    d2_l = max_unpool2x2(d2_l, id2)
    d1_l = tfi_forward(P['tfi_1'], d2_g, d2_l, e1)
    d1_l = sbfi_forward(P['sbfi_1'], d1_l, e0)
    d1_l = run_decoder(d1_l, P['decoder1_l'])
    d1_l = max_unpool2x2(d1_l, id1)
    d0_l = tfi_forward(P['tfi_0'], d1_g, d1_l, e0p)
    d0_l = sbfi_forward(P['sbfi_0'], d0_l, e0)
    d0_l = run_decoder(d0_l, P['decoder0_l'])
    d0_l = max_unpool2x2(d0_l, id0)
    # final 3x3 conv with the sigmoid fused into the kernel epilogue
    local_sigmoid = conv2d(d0_l, P['decoder_final_l'], act='sigmoid',
                           out_dtype=jnp.float32)

    fusion_sigmoid = get_masked_local_from_global(global_sigmoid, local_sigmoid)

    to_nchw = lambda t: jnp.transpose(t.astype(jnp.float32), (0, 3, 1, 2))
    return tuple(to_nchw(t) for t in (global_sigmoid, local_sigmoid,
                                      fusion_sigmoid, side2, side1, side0))


# ----------------------------------------------------------------------------
if __name__ == "__main__":
    key = jax.random.PRNGKey(0)
    # small but architecture-consistent input: 3 channels, spatial 32 (÷32 ok)
    x = jax.random.normal(key, (2, 3, 32, 32), jnp.float32)

    pf = ParamFactory(seed=42)
    params = init_params(pf)
    prepped = prepare_params(params)

    outs = p3mnet_forward(prepped, x)
    for o in outs:
        jax.block_until_ready(o)

    expected = [(2, 3, 32, 32), (2, 1, 32, 32), (2, 1, 32, 32),
                (2, 3, 32, 32), (2, 3, 32, 32), (2, 3, 32, 32)]
    assert [tuple(o.shape) for o in outs] == expected, \
        [tuple(o.shape) for o in outs]
    print("KERNEL_OK")
</pallas_src>

<mosaic_0001>
module attributes {stable_mosaic.version = 11 : i64} {
  func.func @_conv_tap_kernel(%arg0: i32, %arg1: i32, %arg2: memref<1x1024x147xbf16, #tpu.memory_space<vmem>>, %arg3: memref<147x64xbf16, #tpu.memory_space<vmem>>, %arg4: memref<1x64xf32, #tpu.memory_space<vmem>>, %arg5: memref<1x1024x64xbf16, #tpu.memory_space<vmem>>) attributes {dimension_semantics = [#tpu.dimension_semantics<parallel>, #tpu.dimension_semantics<parallel>], iteration_bounds = array<i64: 2, 1>, scalar_prefetch = 0 : i64, scratch_operands = 0 : i64, tpu.core_type = #tpu.core_type<tc>, window_params = [{transform_indices = @transform_0, window_bounds = array<i64: 1, 1024, 147>}, {transform_indices = @transform_1, window_bounds = array<i64: 147, 64>}, {transform_indices = @transform_2, window_bounds = array<i64: 1, 64>}, {transform_indices = @transform_3, window_bounds = array<i64: 1, 1024, 64>}]} {
    %cst = arith.constant 0.000000e+00 : f32
    %0 = vector.broadcast %cst : f32 to vector<1024x64xf32>
    %c0 = arith.constant 0 : index
    %c0_0 = arith.constant 0 : index
    %c0_1 = arith.constant 0 : index
    %1 = vector.load %arg2[%c0, %c0_0, %c0_1] : memref<1x1024x147xbf16, #tpu.memory_space<vmem>>, vector<1x1024x147xbf16>
    %2 = vector.shape_cast %1 : vector<1x1024x147xbf16> to vector<1024x147xbf16>
    %c0_2 = arith.constant 0 : index
    %c0_3 = arith.constant 0 : index
    %3 = vector.load %arg3[%c0_2, %c0_3] : memref<147x64xbf16, #tpu.memory_space<vmem>>, vector<147x64xbf16>
    %cst_4 = arith.constant dense<0.000000e+00> : vector<1024x64xf32>
    %4 = tpu.matmul %2, %3, %cst_4 {dimension_numbers = #tpu.dot_dimension_numbers<[1], [0], [0], [1], [0, 0, 1, 1], [], []>} : vector<1024x147xbf16>, vector<147x64xbf16>, vector<1024x64xf32> -> vector<1024x64xf32>
    %5 = arith.addf %0, %4 : vector<1024x64xf32>
    %c0_5 = arith.constant 0 : index
    %c0_6 = arith.constant 0 : index
    %6 = vector.load %arg4[%c0_5, %c0_6] : memref<1x64xf32, #tpu.memory_space<vmem>>, vector<1x64xf32>
    %7 = vector.broadcast %6 : vector<1x64xf32> to vector<1024x64xf32>
    %8 = arith.addf %5, %7 : vector<1024x64xf32>
    %cst_7 = arith.constant 0.000000e+00 : f32
    %9 = vector.broadcast %cst_7 : f32 to vector<1024x64xf32>
    %10 = arith.maximumf %8, %9 : vector<1024x64xf32>
    %11 = arith.truncf %10 : vector<1024x64xf32> to vector<1024x64xbf16>
    %c0_8 = arith.constant 0 : index
    %c0_9 = arith.constant 0 : index
    %c0_10 = arith.constant 0 : index
    %12 = vector.load %arg5[%c0_8, %c0_9, %c0_10] : memref<1x1024x64xbf16, #tpu.memory_space<vmem>>, vector<1x1024x64xbf16>
    %13 = vector.shape_cast %12 : vector<1x1024x64xbf16> to vector<1024x64xbf16>
    %14 = vector.shape_cast %11 : vector<1024x64xbf16> to vector<1x1024x64xbf16>
    tpu.vector_store %arg5[%c0_8, %c0_9, %c0_10], %14 {strides = array<i32>} : memref<1x1024x64xbf16, #tpu.memory_space<vmem>>, vector<1x1024x64xbf16>,
    return
  }
  func.func @transform_0(%arg0: i32, %arg1: i32) -> (i32, i32, i32) {
    %c0_i32 = arith.constant 0 : i32
    %c0_i32_0 = arith.constant 0 : i32
    %c0_i32_1 = arith.constant 0 : i32
    return %arg0, %c0_i32, %c0_i32_0 : i32, i32, i32
  }
  func.func @transform_1(%arg0: i32, %arg1: i32) -> (i32, i32) {
    %c0_i32 = arith.constant 0 : i32
    %c0_i32_0 = arith.constant 0 : i32
    return %c0_i32, %arg1 : i32, i32
  }
  func.func @transform_2(%arg0: i32, %arg1: i32) -> (i32, i32) {
    %c0_i32 = arith.constant 0 : i32
    %c0_i32_0 = arith.constant 0 : i32
    return %c0_i32, %arg1 : i32, i32
  }
  func.func @transform_3(%arg0: i32, %arg1: i32) -> (i32, i32, i32) {
    %c0_i32 = arith.constant 0 : i32
    %c0_i32_0 = arith.constant 0 : i32
    return %arg0, %c0_i32, %arg1 : i32, i32, i32
  }
}

</mosaic_0001>

<bundles_post_ra>
// kernel: tpu_custom_call.1
= control target key start
LH: loop header
LB: loop body
LE: loop exit
PB: predicated region body
PF: predicated region fallthrough
CT: control target
= control target key end

     0   :  { %s3202_s12 = smov 0   ;;  %s3204_s13 = smov 0   ;;  %s4139_s0 = inlined_call_operand.vmem [shape: bf16[2,1024,147], index: 0, kind: input, shape index: {}]   ;;  %s4140_s1 = inlined_call_operand.vmem [shape: bf16[147,64], index: 1, kind: input, shape index: {}]   ;;  %s4141_s2 = inlined_call_operand.vmem [shape: f32[1,64], index: 2, kind: input, shape index: {}]   ;;  %s4142_s3 = inlined_call_operand.vmem [shape: bf16[2,1024,64], index: 3, kind: output, shape index: {}]  }
   0x1   :  { %s3206_s14 = smov 0  }
   0x2 LB: > { %s25_s15 = sadd.s32 1, %s3175_s13  ;;  %p2361_p0 = scmp.ge.s32.totalorder %s3179_s14, 1  ;;  %s3179_s14 = sphi %s3206_s14, %s13_s14   ;;  %s3175_s13 = sphi %s3204_s13, %s4144_s13   ;;  %s3171_s12 = sphi %s3202_s12, %s4143_s12  }
   0x3   : > { %p27_p1 = scmp.ge.s32.totalorder %s25_s15, 2  ;;  %p168_p2 = scmp.lt.s32.totalorder %s3179_s14, 3 }
   0x5   : > { %s4146_s15 = smov (%p27_p1, %s25_s15), 0  ;;  %p169_p3 = pnand %p2361_p0, %p168_p2 }
   0x6   : > { %p202_p4 = scmp.lt.s32.totalorder (!%p169_p3), %s3171_s12, 1 }
   0x7   : > { %172 = sbr.rel (%p169_p3) target bundleno = 689 (0x2b1), region = 32 }
   0xc   : > { %v3117_v0 = vld [vmem:[%s4140_s1 + $0x38] sm:$0xff]  ;;  %v369_v1 = vld [vmem:[%s4140_s1 + $0x48] sm:$0x3]  ;;  %vm1200_vm0 = vcmask 1040384   ;;  %vm1201_vm1 = vcmask 1041408   ;;  %v3116_v3 = vld [vmem:[%s4140_s1 + $0x30] sm:$0xff] }
   0xd   : > { %v987_v2 = vunpack.c.l.b16 %v369_v1  ;;  %1207 = vmatpush.bf16.msra.mxu0 %v3117_v0  ;;  %3119 = vmatpush.bf16.msra.mxu2 %v3117_v0  ;;  %v3181_v4 = vmov 65535   ;;  %s4148_s12 = smov (!%p202_p4, %s3171_s12), 1  ;;  %v3115_v9 = vld [vmem:[%s4140_s1 + $0x28] sm:$0xff]  ;;  %v3118_v10 = vld [vmem:[%s4140_s1 + $0x40] sm:$0xff]  ;;  %vm1007_vm2 = vcmask 154624   ;;  %v3113_v18 = vld [vmem:[%s4140_s1 + $0x18] sm:$0xff] }
   0xe   : > { %v1202_v5 = vsel %vm1200_vm0, 4294967295, %v3181_v4  ;;  %s2980_s22 = sshll.u32 %s4148_s12, 10  ;;  %v3114_v15 = vld [vmem:[%s4140_s1 + $0x20] sm:$0xff]  ;;  %v3112_v19 = vld [vmem:[%s4140_s1 + $0x10] sm:$0xff]  ;;  %v3111_v20 = vld [vmem:[%s4140_s1 + $0x8] sm:$0xff]  ;;  %s2981_s19 = sshll.u32 %s4148_s12, 9 }
   0xf   : > { %v997_v6 = vpack.c.b16 %v987_v2, %v987_v2  ;;  %v1203_v7 = vsel %vm1201_vm1, %v1202_v5, 0  ;;  %s3238_s27 = scalar_lea.vmem %s4139_s0, %s2980_s22  ;;  %v3110_v26 = vld [vmem:[%s4140_s1] sm:$0xff]  ;;  %s3370_s22 = scalar_lea.vmem %s4142_s3, %s2981_s19  ;;  %vm2121_vm3 = vcmask 519168  }
  0x10   : > { %v2982_v11 = vld [vmem:[%s3238_s27 + $0x4] sm:$0xf]  ;;  %v2370_v12 = vld [vmem:[%s3238_s27 + $0x8] sm:$0xf0]  ;;  %v3048_v13 = vld [vmem:[%s3238_s27 + $0x214] sm:$0xf] }
  0x11   : > { %v1205_v8 = vand.u32 %v1203_v7, %v997_v6  ;;  %1208 = vmatpush.bf16.msra.mxu0 %v3116_v3  ;;  %3120 = vmatpush.bf16.msra.mxu2 %v3116_v3  ;;  %v2373_v14 = vor.u32 %v2982_v11, %v2370_v12  ;;  %v2634_v16 = vld [vmem:[%s3238_s27 + $0x218] sm:$0xf0]  ;;  %v2984_v21 = vld [vmem:[%s3238_s27 + $0x14] sm:$0xf]  ;;  %v3050_v23 = vld [vmem:[%s3238_s27 + $0x224] sm:$0xf] }
  0x12   : > { %v2637_v17 = vor.u32 %v3048_v13, %v2634_v16  ;;  %v2378_v22 = vld [vmem:[%s3238_s27 + $0x18] sm:$0xf0]  ;;  %v2642_v24 = vld [vmem:[%s3238_s27 + $0x228] sm:$0xf0]  ;;  %v2368_v27 = vld [vmem:[%s3238_s27] sm:$0xf] }
  0x13   : > { %1542 = vmatpush.bf16.msra.mxu1 %v1205_v8  ;;  %3127 = vmatpush.bf16.msra.mxu3 %v1205_v8  ;;  %v2381_v25 = vor.u32 %v2984_v21, %v2378_v22  ;;  %v2983_v28 = vld [vmem:[%s3238_s27 + $0x4] sm:$0xf0]  ;;  %v2624_v29 = vld [vmem:[%s3238_s27 + $0x200] sm:$0xf]  ;;  %v2645_v31 = vor.u32 %v3050_v23, %v2642_v24  ;;  %v2986_v34 = vld [vmem:[%s3238_s27 + $0x24] sm:$0xf] }
  0x14   : > { %v3047_v30 = vld [vmem:[%s3238_s27 + $0x204] sm:$0xf0]  ;;  %v2369_v32 = vor.u32 %v2983_v28, %v2368_v27  ;;  %v2386_v35 = vld [vmem:[%s3238_s27 + $0x28] sm:$0xf0]  ;;  %v3052_v36 = vld [vmem:[%s3238_s27 + $0x234] sm:$0xf] }
  0x15   : > { %1209 = vmatpush.bf16.msra.mxu0 %v3115_v9  ;;  %3121 = vmatpush.bf16.msra.mxu2 %v3115_v9  ;;  %v2625_v33 = vor.u32 %v3047_v30, %v2624_v29  ;;  %v2650_v37 = vld [vmem:[%s3238_s27 + $0x238] sm:$0xf0]  ;;  %v2389_v38 = vor.u32 %v2986_v34, %v2386_v35  ;;  %v2376_v39 = vld [vmem:[%s3238_s27 + $0x10] sm:$0xf]  ;;  %v2985_v40 = vld [vmem:[%s3238_s27 + $0x14] sm:$0xf0] }
  0x16   : > { %v2632_v41 = vld [vmem:[%s3238_s27 + $0x210] sm:$0xf]  ;;  %v3049_v42 = vld [vmem:[%s3238_s27 + $0x214] sm:$0xf0]  ;;  %v2653_v43 = vor.u32 %v3052_v36, %v2650_v37  ;;  %v2377_v44 = vor.u32 %v2985_v40, %v2376_v39  ;;  %v2988_v46 = vld [vmem:[%s3238_s27 + $0x34] sm:$0xf] }
  0x17   : > { %1543 = vmatpush.bf16.msra.mxu1 %v3118_v10  ;;  %3128 = vmatpush.bf16.msra.mxu3 %v3118_v10  ;;  %v2633_v45 = vor.u32 %v3049_v42, %v2632_v41  ;;  %v2394_v47 = vld [vmem:[%s3238_s27 + $0x38] sm:$0xf0]  ;;  %v3054_v48 = vld [vmem:[%s3238_s27 + $0x244] sm:$0xf]  ;;  %v2658_v49 = vld [vmem:[%s3238_s27 + $0x248] sm:$0xf0] }
  0x18   : > { %v2397_v50 = vor.u32 %v2988_v46, %v2394_v47  ;;  %v2384_v51 = vld [vmem:[%s3238_s27 + $0x20] sm:$0xf]  ;;  %v2987_v52 = vld [vmem:[%s3238_s27 + $0x24] sm:$0xf0]  ;;  %v2661_v55 = vor.u32 %v3054_v48, %v2658_v49  ;;  %v2990_v58 = vld [vmem:[%s3238_s27 + $0x44] sm:$0xf] }
  0x19   : > { %1210 = vmatpush.bf16.msra.mxu0 %v3114_v15  ;;  %3122 = vmatpush.bf16.msra.mxu2 %v3114_v15  ;;  %v2640_v53 = vld [vmem:[%s3238_s27 + $0x220] sm:$0xf]  ;;  %v3051_v54 = vld [vmem:[%s3238_s27 + $0x224] sm:$0xf0]  ;;  %v2385_v56 = vor.u32 %v2987_v52, %v2384_v51  ;;  %v2402_v59 = vld [vmem:[%s3238_s27 + $0x48] sm:$0xf0] }
  0x1a   : > { %2914 = vmatmul.msk.bf16.vlgmr.msra.gmra.mxu1 %vm1007_vm2, %v2373_v14  ;;  %2947 = vmatmul.msk.bf16.vlgmr.msra.gmra.mxu3 %vm1007_vm2, %v2637_v17  ;;  %v2641_v57 = vor.u32 %v3051_v54, %v2640_v53  ;;  %v3056_v60 = vld [vmem:[%s3238_s27 + $0x254] sm:$0xf]  ;;  %v2666_v61 = vld [vmem:[%s3238_s27 + $0x258] sm:$0xf0]  ;;  %v2405_v62 = vor.u32 %v2990_v58, %v2402_v59  ;;  %v2392_v63 = vld [vmem:[%s3238_s27 + $0x30] sm:$0xf] }
  0x1b   : > { %v2989_v0 = vld [vmem:[%s3238_s27 + $0x34] sm:$0xf0]  ;;  %v2648_v1 = vld [vmem:[%s3238_s27 + $0x230] sm:$0xf]  ;;  %v2669_v3 = vor.u32 %v3056_v60, %v2666_v61  ;;  %v2992_v6 = vld [vmem:[%s3238_s27 + $0x54] sm:$0xf] }
  0x1c   : > { %v3053_v2 = vld [vmem:[%s3238_s27 + $0x234] sm:$0xf0]  ;;  %v2393_v4 = vor.u32 %v2989_v0, %v2392_v63  ;;  %v2410_v7 = vld [vmem:[%s3238_s27 + $0x58] sm:$0xf0]  ;;  %v3058_v8 = vld [vmem:[%s3238_s27 + $0x264] sm:$0xf] }
  0x1d   : > { %1211 = vmatpush.bf16.msra.mxu0 %v3113_v18  ;;  %3123 = vmatpush.bf16.msra.mxu2 %v3113_v18  ;;  %v2649_v5 = vor.u32 %v3053_v2, %v2648_v1  ;;  %v2674_v9 = vld [vmem:[%s3238_s27 + $0x268] sm:$0xf0]  ;;  %v2413_v10 = vor.u32 %v2992_v6, %v2410_v7  ;;  %v2400_v11 = vld [vmem:[%s3238_s27 + $0x40] sm:$0xf]  ;;  %v2991_v12 = vld [vmem:[%s3238_s27 + $0x44] sm:$0xf0] }
  0x1e   : > { %v2656_v13 = vld [vmem:[%s3238_s27 + $0x240] sm:$0xf]  ;;  %v3055_v14 = vld [vmem:[%s3238_s27 + $0x244] sm:$0xf0]  ;;  %v2677_v15 = vor.u32 %v3058_v8, %v2674_v9  ;;  %v2401_v16 = vor.u32 %v2991_v12, %v2400_v11  ;;  %v2994_v18 = vld [vmem:[%s3238_s27 + $0x64] sm:$0xf] }
  0x1f   : > { %v2657_v17 = vor.u32 %v3055_v14, %v2656_v13  ;;  %v2682_v21 = vld [vmem:[%s3238_s27 + $0x278] sm:$0xf0]  ;;  %v2408_v23 = vld [vmem:[%s3238_s27 + $0x50] sm:$0xf]  ;;  %v2993_v24 = vld [vmem:[%s3238_s27 + $0x54] sm:$0xf0] }
  0x20   : > { %v2409_v28 = vor.u32 %v2993_v24, %v2408_v23  ;;  %v2996_v30 = vld [vmem:[%s3238_s27 + $0x74] sm:$0xf]  ;;  %v2416_v35 = vld [vmem:[%s3238_s27 + $0x60] sm:$0xf]  ;;  %v2995_v36 = vld [vmem:[%s3238_s27 + $0x64] sm:$0xf0] }
  0x21   : > { %1212 = vmatpush.bf16.msra.mxu0 %v3112_v19  ;;  %3124 = vmatpush.bf16.msra.mxu2 %v3112_v19  ;;  %v2418_v19 = vld [vmem:[%s3238_s27 + $0x68] sm:$0xf0]  ;;  %v2672_v37 = vld [vmem:[%s3238_s27 + $0x260] sm:$0xf]  ;;  %v2417_v40 = vor.u32 %v2995_v36, %v2416_v35  ;;  %v2998_v42 = vld [vmem:[%s3238_s27 + $0x84] sm:$0xf] }
  0x22   : > { %v2421_v22 = vor.u32 %v2994_v18, %v2418_v19  ;;  %v2424_v47 = vld [vmem:[%s3238_s27 + $0x70] sm:$0xf]  ;;  %v2997_v48 = vld [vmem:[%s3238_s27 + $0x74] sm:$0xf0]  ;;  %v2442_v58 = vld [vmem:[%s3238_s27 + $0x98] sm:$0xf0] }
  0x23   : > { %v3061_v51 = vld [vmem:[%s3238_s27 + $0x274] sm:$0xf0]  ;;  %v2425_v53 = vor.u32 %v2997_v48, %v2424_v47  ;;  %v3066_v59 = vld [vmem:[%s3238_s27 + $0x2a4] sm:$0xf]  ;;  %v2706_v60 = vld [vmem:[%s3238_s27 + $0x2a8] sm:$0xf0] }
  0x24   : > { %v2999_v63 = vld [vmem:[%s3238_s27 + $0x84] sm:$0xf0]  ;;  %v3357_v2 = vld [vmem:[%s4141_s2] ss:$0 sm:$0xff]  ;;  %v3002_v18 = vld [vmem:[%s3238_s27 + $0xa4] sm:$0xf] }
  0x25   : > { %1213 = vmatpush.bf16.msra.mxu0 %v3111_v20  ;;  %3125 = vmatpush.bf16.msra.mxu2 %v3111_v20  ;;  %v3060_v20 = vld [vmem:[%s3238_s27 + $0x274] sm:$0xf]  ;;  %v2450_v19 = vld [vmem:[%s3238_s27 + $0xa8] sm:$0xf0]  ;;  %v2440_v24 = vld [vmem:[%s3238_s27 + $0x90] sm:$0xf] }
  0x26   : > { %v2685_v27 = vor.u32 %v3060_v20, %v2682_v21  ;;  %v3068_v21 = vld [vmem:[%s3238_s27 + $0x2b4] sm:$0xf]  ;;  %v2453_v23 = vor.u32 %v3002_v18, %v2450_v19  ;;  %v2458_v48 = vld [vmem:[%s3238_s27 + $0xb8] sm:$0xf0] }
  0x27   : > { %v3004_v47 = vld [vmem:[%s3238_s27 + $0xb4] sm:$0xf] }
  0x29   : > { %1214 = vmatpush.bf16.msra.mxu0 %v3110_v26  ;;  %3126 = vmatpush.bf16.msra.mxu2 %v3110_v26  ;;  %v3057_v26 = vld [vmem:[%s3238_s27 + $0x254] sm:$0xf0] }
  0x2a   : > { %2915 = vmatmul.msk.bf16.gmra.mxu1 %vm1007_vm2, %v2381_v25  ;;  %2948 = vmatmul.msk.bf16.gmra.mxu3 %vm1007_vm2, %v2645_v31  ;;  %v2664_v25 = vld [vmem:[%s3238_s27 + $0x250] sm:$0xf]  ;;  %v2426_v31 = vld [vmem:[%s3238_s27 + $0x78] sm:$0xf0] }
  0x2b   : > { %v2665_v29 = vor.u32 %v3057_v26, %v2664_v25  ;;  %v2429_v34 = vor.u32 %v2996_v30, %v2426_v31  ;;  %v3001_v25 = vld [vmem:[%s3238_s27 + $0x94] sm:$0xf0] }
  0x2c   : > { %1215 = vmatmul.bf16.vlgmr.msra.gmra.mxu0 %v2369_v32  ;;  %1375 = vmatmul.bf16.vlgmr.msra.gmra.mxu2 %v2625_v33  ;;  %v3062_v32 = vld [vmem:[%s3238_s27 + $0x284] sm:$0xf]  ;;  %v2690_v33 = vld [vmem:[%s3238_s27 + $0x288] sm:$0xf0]  ;;  %v3065_v30 = vld [vmem:[%s3238_s27 + $0x294] sm:$0xf0] }
  0x2d   : > { %v2693_v39 = vor.u32 %v3062_v32, %v2690_v33 }
  0x3a   : > { %2916 = vmatmul.msk.bf16.gmra.mxu1 %vm1007_vm2, %v2389_v38  ;;  %2949 = vmatmul.msk.bf16.gmra.mxu3 %vm1007_vm2, %v2653_v43  ;;  %v3059_v38 = vld [vmem:[%s3238_s27 + $0x264] sm:$0xf0]  ;;  %v2434_v43 = vld [vmem:[%s3238_s27 + $0x88] sm:$0xf0] }
  0x3b   : > { %v2673_v41 = vor.u32 %v3059_v38, %v2672_v37  ;;  %v2437_v46 = vor.u32 %v2998_v42, %v2434_v43 }
  0x3c   : > { %1220 = vmatmul.bf16.gmra.mxu0 %v2377_v44  ;;  %1380 = vmatmul.bf16.gmra.mxu2 %v2633_v45  ;;  %v3064_v44 = vld [vmem:[%s3238_s27 + $0x294] sm:$0xf]  ;;  %v2698_v45 = vld [vmem:[%s3238_s27 + $0x298] sm:$0xf0] }
  0x3d   : > { %v2701_v52 = vor.u32 %v3064_v44, %v2698_v45 }
  0x4a   : > { %2917 = vmatmul.msk.bf16.gmra.mxu1 %vm1007_vm2, %v2397_v50  ;;  %2950 = vmatmul.msk.bf16.gmra.mxu3 %vm1007_vm2, %v2661_v55  ;;  %v2680_v50 = vld [vmem:[%s3238_s27 + $0x270] sm:$0xf] }
  0x4b   : > { %v2681_v54 = vor.u32 %v3061_v51, %v2680_v50  ;;  %v3070_v51 = vld [vmem:[%s3238_s27 + $0x2c4] sm:$0xf] }
  0x4c   : > { %1225 = vmatmul.bf16.gmra.mxu0 %v2385_v56  ;;  %1385 = vmatmul.bf16.gmra.mxu2 %v2641_v57  ;;  %v3000_v57 = vld [vmem:[%s3238_s27 + $0x94] sm:$0xf] }
  0x4d   : > { %v2445_v61 = vor.u32 %v3000_v57, %v2442_v58  ;;  %v3003_v57 = vld [vmem:[%s3238_s27 + $0xa4] sm:$0xf0] }
  0x5a   : > { %2918 = vmatmul.msk.bf16.gmra.mxu1 %vm1007_vm2, %v2405_v62  ;;  %2951 = vmatmul.msk.bf16.gmra.mxu3 %vm1007_vm2, %v2669_v3  ;;  %v2432_v62 = vld [vmem:[%s3238_s27 + $0x80] sm:$0xf] }
  0x5b   : > { %v2688_v3 = vld [vmem:[%s3238_s27 + $0x280] sm:$0xf]  ;;  %v2433_v6 = vor.u32 %v2999_v63, %v2432_v62  ;;  %v3067_v62 = vld [vmem:[%s3238_s27 + $0x2a4] sm:$0xf0] }
  0x5c   : > { %1230 = vmatmul.bf16.gmra.mxu0 %v2393_v4  ;;  %1390 = vmatmul.bf16.gmra.mxu2 %v2649_v5  ;;  %v3063_v4 = vld [vmem:[%s3238_s27 + $0x284] sm:$0xf0]  ;;  %v2709_v5 = vor.u32 %v3066_v59, %v2706_v60 }
  0x5d   : > { %v2689_v8 = vor.u32 %v3063_v4, %v2688_v3 }
  0x6a   : > { %2919 = vmatmul.msk.bf16.gmra.mxu1 %vm1007_vm2, %v2413_v10  ;;  %2952 = vmatmul.msk.bf16.gmra.mxu3 %vm1007_vm2, %v2677_v15 }
  0x6c   : > { %1235 = vmatmul.bf16.gmra.mxu0 %v2401_v16  ;;  %1395 = vmatmul.bf16.gmra.mxu2 %v2657_v17 }
  0x7a   : > { %2920 = vmatmul.msk.bf16.gmra.mxu1 %vm1007_vm2, %v2421_v22  ;;  %2953 = vmatmul.msk.bf16.gmra.mxu3 %vm1007_vm2, %v2685_v27  ;;  %v2714_v22 = vld [vmem:[%s3238_s27 + $0x2b8] sm:$0xf0] }
  0x7b   : > { %v2717_v31 = vor.u32 %v3068_v21, %v2714_v22  ;;  %v3006_v22 = vld [vmem:[%s3238_s27 + $0xc4] sm:$0xf] }
  0x7c   : > { %1240 = vmatmul.bf16.gmra.mxu0 %v2409_v28  ;;  %1400 = vmatmul.bf16.gmra.mxu2 %v2665_v29  ;;  %v2696_v29 = vld [vmem:[%s3238_s27 + $0x290] sm:$0xf] }
  0x7d   : > { %v2697_v36 = vor.u32 %v3065_v30, %v2696_v29 }
  0x8a   : > { %2921 = vmatmul.msk.bf16.gmra.mxu1 %vm1007_vm2, %v2429_v34  ;;  %2954 = vmatmul.msk.bf16.gmra.mxu3 %vm1007_vm2, %v2693_v39  ;;  %v2441_v34 = vor.u32 %v3001_v25, %v2440_v24 }
  0x8c   : > { %1245 = vmatmul.bf16.gmra.mxu0 %v2417_v40  ;;  %1405 = vmatmul.bf16.gmra.mxu2 %v2673_v41 }
  0x97   : > { %v1545_v49 = vpop.f32.mrf.mxu1 }
  0x9a   : > { %2922 = vmatmul.msk.bf16.gmra.mxu1 %vm1007_vm2, %v2437_v46  ;;  %2955 = vmatmul.msk.bf16.gmra.mxu3 %vm1007_vm2, %v2701_v52  ;;  %v2722_v52 = vld [vmem:[%s3238_s27 + $0x2c8] sm:$0xf0] }
  0x9b   : > { %v2725_v63 = vor.u32 %v3070_v51, %v2722_v52 }
  0x9c   : > { %1250 = vmatmul.bf16.gmra.mxu0 %v2425_v53  ;;  %1410 = vmatmul.bf16.gmra.mxu2 %v2681_v54  ;;  %v2461_v54 = vor.u32 %v3004_v47, %v2458_v48 }
  0x9d   : > { %v3344_v55 = vpop.f32.mrf.mxu3 }
  0x9f   : > { %v1547_v56 = vpop.f32.mrf.mxu1 }
  0xa5   : > { %v3352_v0 = vpop.f32.mrf.mxu3 }
  0xa7   : > { %v1550_v1 = vpop.f32.mrf.mxu1 }
  0xa9   : > { %v1216_v7 = vpop.f32.mrf.mxu0 }
  0xaa   : > { %2923 = vmatmul.msk.bf16.gmra.mxu1 %vm1007_vm2, %v2445_v61  ;;  %v1217_v9 = vadd.f32 %v3357_v2, %v1216_v7  ;;  %2956 = vmatmul.msk.bf16.gmra.mxu3 %vm1007_vm2, %v2709_v5  ;;  %v2704_v61 = vld [vmem:[%s3238_s27 + $0x2a0] sm:$0xf] }
  0xab   : > { %v2705_v7 = vor.u32 %v3067_v62, %v2704_v61  ;;  %v3008_v61 = vld [vmem:[%s3238_s27 + $0xd4] sm:$0xf]  ;;  %v2474_v62 = vld [vmem:[%s3238_s27 + $0xd8] sm:$0xf0] }
  0xac   : > { %v1546_v10 = vadd.f32 %v1545_v49, %v1217_v9  ;;  %1255 = vmatmul.bf16.gmra.mxu0 %v2433_v6  ;;  %1415 = vmatmul.bf16.gmra.mxu2 %v2689_v8 }
  0xad   : > { %v3365_v11 = vpop.f32.mrf.mxu3 }
  0xae   : > { %v1865_v12 = vmax.f32 %v1546_v10, 0.0 }
  0xaf   : > { %v1552_v13 = vpop.f32.mrf.mxu1  ;;  %v3372_v15 = vpop.f32.mrf.mxu2 }
  0xb0   : > { %v1993_v14 = vpack.c.bf16 %v1865_v12, %v1865_v12 }
  0xb1   : > { %v1218_v16 = vpop.f32.mrf.mxu0 }
  0xb2   : > { %2122 = vst.msk [vmem:[%s3370_s22] sm:$0xf] %vm2121_vm3, %v1993_v14  ;;  %v1219_v17 = vadd.f32 %v3357_v2, %v1218_v16 }
  0xb4   : > { %v1548_v20 = vadd.f32 %v1547_v56, %v1219_v17  ;;  %v2448_v56 = vld [vmem:[%s3238_s27 + $0xa0] sm:$0xf] }
  0xb5   : > { %v3383_v26 = vpop.f32.mrf.mxu3 }
  0xb6   : > { %v1866_v27 = vmax.f32 %v1548_v20, 0.0 }
  0xb7   : > { %v1555_v28 = vpop.f32.mrf.mxu1  ;;  %v3387_v33 = vpop.f32.mrf.mxu2 }
  0xb8   : > { %v1994_v32 = vpack.c.bf16 %v1866_v27, %v1866_v27  ;;  %v3072_v27 = vld [vmem:[%s3238_s27 + $0x2d4] sm:$0xf] }
  0xb9   : > { %v1221_v35 = vpop.f32.mrf.mxu0 }
  0xba   : > { %2924 = vmatmul.msk.bf16.gmra.mxu1 %vm1007_vm2, %v2453_v23  ;;  %2123 = vst.msk [vmem:[%s3370_s22 + $0x4] sm:$0xf] %vm2121_vm3, %v1994_v32  ;;  %v1222_v37 = vadd.f32 %v3357_v2, %v1221_v35  ;;  %2957 = vmatmul.msk.bf16.gmra.mxu3 %vm1007_vm2, %v2717_v31  ;;  %v2466_v23 = vld [vmem:[%s3238_s27 + $0xc8] sm:$0xf0]  ;;  %v2456_v31 = vld [vmem:[%s3238_s27 + $0xb0] sm:$0xf] }
  0xbb   : > { %v2469_v30 = vor.u32 %v3006_v22, %v2466_v23  ;;  %v3005_v32 = vld [vmem:[%s3238_s27 + $0xb4] sm:$0xf0] }
  0xbc   : > { %v1551_v38 = vadd.f32 %v1550_v1, %v1222_v37  ;;  %1260 = vmatmul.bf16.gmra.mxu0 %v2441_v34  ;;  %1420 = vmatmul.bf16.gmra.mxu2 %v2697_v36  ;;  %v2712_v37 = vld [vmem:[%s3238_s27 + $0x2b0] sm:$0xf] }
  0xbd   : > { %v3394_v39 = vpop.f32.mrf.mxu3 }
  0xbe   : > { %v1867_v40 = vmax.f32 %v1551_v38, 0.0  ;;  %v3069_v38 = vld [vmem:[%s3238_s27 + $0x2b4] sm:$0xf0] }
  0xbf   : > { %v1557_v41 = vpop.f32.mrf.mxu1  ;;  %v1381_v43 = vpop.f32.mrf.mxu2 }
  0xc0   : > { %v1995_v42 = vpack.c.bf16 %v1867_v40, %v1867_v40  ;;  %v1382_v44 = vadd.f32 %v3357_v2, %v1381_v43 }
  0xc1   : > { %v1223_v45 = vpop.f32.mrf.mxu0 }
  0xc2   : > { %2124 = vst.msk [vmem:[%s3370_s22 + $0x8] sm:$0xf] %vm2121_vm3, %v1995_v42  ;;  %v1224_v46 = vadd.f32 %v3357_v2, %v1223_v45  ;;  %v1711_v49 = vadd.f32 %v3344_v55, %v1382_v44  ;;  %v2449_v55 = vor.u32 %v3003_v57, %v2448_v56 }
  0xc4   : > { %v1553_v50 = vadd.f32 %v1552_v13, %v1224_v46  ;;  %v1931_v53 = vmax.f32 %v1711_v49, 0.0  ;;  %v2713_v46 = vor.u32 %v3069_v38, %v2712_v37  ;;  %v3010_v37 = vld [vmem:[%s3238_s27 + $0xe4] sm:$0xf]  ;;  %v2482_v38 = vld [vmem:[%s3238_s27 + $0xe8] sm:$0xf0] }
  0xc5   : > { %v3407_v58 = vpop.f32.mrf.mxu3 }
  0xc6   : > { %v1868_v59 = vmax.f32 %v1553_v50, 0.0  ;;  %v2059_v1 = vpack.c.bf16 %v1931_v53, %v1931_v53 }
  0xc7   : > { %v1560_v60 = vpop.f32.mrf.mxu1  ;;  %v1383_v4 = vpop.f32.mrf.mxu2 }
  0xc8   : > { %v1996_v3 = vpack.c.bf16 %v1868_v59, %v1868_v59  ;;  %2188 = vst.msk [vmem:[%s3370_s22 + $0x108] sm:$0xf] %vm2121_vm3, %v2059_v1  ;;  %v1384_v5 = vadd.f32 %v3357_v2, %v1383_v4  ;;  %v2738_v4 = vld [vmem:[%s3238_s27 + $0x2e8] sm:$0xf0] }
  0xc9   : > { %v1226_v6 = vpop.f32.mrf.mxu0 }
  0xca   : > { %2925 = vmatmul.msk.bf16.gmra.mxu1 %vm1007_vm2, %v2461_v54  ;;  %2125 = vst.msk [vmem:[%s3370_s22 + $0xc] sm:$0xf] %vm2121_vm3, %v1996_v3  ;;  %v1227_v8 = vadd.f32 %v3357_v2, %v1226_v6  ;;  %2958 = vmatmul.msk.bf16.gmra.mxu3 %vm1007_vm2, %v2725_v63  ;;  %v1713_v9 = vadd.f32 %v3352_v0, %v1384_v5  ;;  %v3074_v3 = vld [vmem:[%s3238_s27 + $0x2e4] sm:$0xf]  ;;  %v2464_v6 = vld [vmem:[%s3238_s27 + $0xc0] sm:$0xf] }
  0xcb   : > { %v2477_v5 = vor.u32 %v3008_v61, %v2474_v62 }
  0xcc   : > { %v1556_v10 = vadd.f32 %v1555_v28, %v1227_v8  ;;  %1265 = vmatmul.bf16.gmra.mxu0 %v2449_v55  ;;  %v1932_v12 = vmax.f32 %v1713_v9, 0.0  ;;  %1425 = vmatmul.bf16.gmra.mxu2 %v2705_v7  ;;  %v2730_v28 = vld [vmem:[%s3238_s27 + $0x2d8] sm:$0xf0]  ;;  %v3007_v7 = vld [vmem:[%s3238_s27 + $0xc4] sm:$0xf0] }
  0xcd   : > { %v3420_v13 = vpop.f32.mrf.mxu3  ;;  %v2733_v40 = vor.u32 %v3072_v27, %v2730_v28 }
  0xce   : > { %v1869_v14 = vmax.f32 %v1556_v10, 0.0  ;;  %v2060_v17 = vpack.c.bf16 %v1932_v12, %v1932_v12  ;;  %v2720_v12 = vld [vmem:[%s3238_s27 + $0x2c0] sm:$0xf] }
  0xcf   : > { %v1562_v16 = vpop.f32.mrf.mxu1  ;;  %v1386_v19 = vpop.f32.mrf.mxu2 }
  0xd0   : > { %v1997_v18 = vpack.c.bf16 %v1869_v14, %v1869_v14  ;;  %2189 = vst.msk [vmem:[%s3370_s22 + $0x10c] sm:$0xf] %vm2121_vm3, %v2060_v17  ;;  %v1387_v0 = vadd.f32 %v3357_v2, %v1386_v19  ;;  %v3071_v14 = vld [vmem:[%s3238_s27 + $0x2c4] sm:$0xf0]  ;;  %v2741_v17 = vor.u32 %v3074_v3, %v2738_v4 }
  0xd1   : > { %v1228_v20 = vpop.f32.mrf.mxu0 }
  0xd2   : > { %2126 = vst.msk [vmem:[%s3370_s22 + $0x10] sm:$0xf] %vm2121_vm3, %v1997_v18  ;;  %v1229_v21 = vadd.f32 %v3357_v2, %v1228_v20  ;;  %v1716_v24 = vadd.f32 %v3365_v11, %v1387_v0  ;;  %v2457_v11 = vor.u32 %v3005_v32, %v2456_v31 }
  0xd4   : > { %v1558_v25 = vadd.f32 %v1557_v41, %v1229_v21  ;;  %v1933_v29 = vmax.f32 %v1716_v24, 0.0  ;;  %v2721_v21 = vor.u32 %v3071_v14, %v2720_v12  ;;  %v3012_v12 = vld [vmem:[%s3238_s27 + $0xf4] sm:$0xf]  ;;  %v2490_v14 = vld [vmem:[%s3238_s27 + $0xf8] sm:$0xf0] }
  0xd5   : > { %v3435_v34 = vpop.f32.mrf.mxu3 }
  0xd6   : > { %v1870_v35 = vmax.f32 %v1558_v25, 0.0  ;;  %v2061_v42 = vpack.c.bf16 %v1933_v29, %v1933_v29 }
  0xd7   : > { %v1565_v36 = vpop.f32.mrf.mxu1  ;;  %v1388_v44 = vpop.f32.mrf.mxu2 }
  0xd8   : > { %v1998_v43 = vpack.c.bf16 %v1870_v35, %v1870_v35  ;;  %2190 = vst.msk [vmem:[%s3370_s22 + $0x110] sm:$0xf] %vm2121_vm3, %v2061_v42  ;;  %v1389_v41 = vadd.f32 %v3357_v2, %v1388_v44  ;;  %v2746_v44 = vld [vmem:[%s3238_s27 + $0x2f8] sm:$0xf0] }
  0xd9   : > { %v1231_v45 = vpop.f32.mrf.mxu0 }
  0xda   : > { %2926 = vmatmul.msk.bf16.gmra.mxu1 %vm1007_vm2, %v2469_v30  ;;  %2127 = vst.msk [vmem:[%s3370_s22 + $0x14] sm:$0xf] %vm2121_vm3, %v1998_v43  ;;  %v1232_v47 = vadd.f32 %v3357_v2, %v1231_v45  ;;  %2959 = vmatmul.msk.bf16.gmra.mxu3 %vm1007_vm2, %v2733_v40  ;;  %v1718_v48 = vadd.f32 %v3383_v26, %v1389_v41  ;;  %v3076_v43 = vld [vmem:[%s3238_s27 + $0x2f4] sm:$0xf]  ;;  %v2472_v45 = vld [vmem:[%s3238_s27 + $0xd0] sm:$0xf] }
  0xdb   : > { %v2485_v41 = vor.u32 %v3010_v37, %v2482_v38 }
  0xdc   : > { %v1561_v49 = vadd.f32 %v1560_v60, %v1232_v47  ;;  %1270 = vmatmul.bf16.gmra.mxu0 %v2457_v11  ;;  %v1934_v50 = vmax.f32 %v1718_v48, 0.0  ;;  %1430 = vmatmul.bf16.gmra.mxu2 %v2713_v46  ;;  %v3009_v46 = vld [vmem:[%s3238_s27 + $0xd4] sm:$0xf0] }
  0xdd   : > { %v3448_v51 = vpop.f32.mrf.mxu3 }
  0xde   : > { %v1871_v52 = vmax.f32 %v1561_v49, 0.0  ;;  %v2062_v54 = vpack.c.bf16 %v1934_v50, %v1934_v50  ;;  %v2728_v50 = vld [vmem:[%s3238_s27 + $0x2d0] sm:$0xf] }
  0xdf   : > { %v1567_v53 = vpop.f32.mrf.mxu1  ;;  %v1391_v57 = vpop.f32.mrf.mxu2 }
  0xe0   : > { %v1999_v56 = vpack.c.bf16 %v1871_v52, %v1871_v52  ;;  %2191 = vst.msk [vmem:[%s3370_s22 + $0x114] sm:$0xf] %vm2121_vm3, %v2062_v54  ;;  %v1392_v26 = vadd.f32 %v3357_v2, %v1391_v57  ;;  %v3073_v52 = vld [vmem:[%s3238_s27 + $0x2d4] sm:$0xf0]  ;;  %v2749_v54 = vor.u32 %v3076_v43, %v2746_v44 }
  0xe1   : > { %v1233_v59 = vpop.f32.mrf.mxu0 }
  0xe2   : > { %2128 = vst.msk [vmem:[%s3370_s22 + $0x18] sm:$0xf] %vm2121_vm3, %v1999_v56  ;;  %v1234_v60 = vadd.f32 %v3357_v2, %v1233_v59  ;;  %v1721_v63 = vadd.f32 %v3394_v39, %v1392_v26  ;;  %v2465_v39 = vor.u32 %v3007_v7, %v2464_v6 }
  0xe4   : > { %v1563_v1 = vadd.f32 %v1562_v16, %v1234_v60  ;;  %v1935_v55 = vmax.f32 %v1721_v63, 0.0  ;;  %v2729_v60 = vor.u32 %v3073_v52, %v2728_v50  ;;  %v3014_v50 = vld [vmem:[%s3238_s27 + $0x104] sm:$0xf]  ;;  %v2498_v52 = vld [vmem:[%s3238_s27 + $0x108] sm:$0xf0] }
  0xe5   : > { %v3463_v8 = vpop.f32.mrf.mxu3 }
  0xe6   : > { %v1872_v9 = vmax.f32 %v1563_v1, 0.0  ;;  %v2063_v18 = vpack.c.bf16 %v1935_v55, %v1935_v55 }
  0xe7   : > { %v1570_v10 = vpop.f32.mrf.mxu1  ;;  %v1393_v0 = vpop.f32.mrf.mxu2 }
  0xe8   : > { %v2000_v19 = vpack.c.bf16 %v1872_v9, %v1872_v9  ;;  %2192 = vst.msk [vmem:[%s3370_s22 + $0x118] sm:$0xf] %vm2121_vm3, %v2063_v18  ;;  %v1394_v16 = vadd.f32 %v3357_v2, %v1393_v0  ;;  %v2754_v0 = vld [vmem:[%s3238_s27 + $0x308] sm:$0xf0] }
  0xe9   : > { %v1236_v20 = vpop.f32.mrf.mxu0 }
  0xea   : > { %2927 = vmatmul.msk.bf16.gmra.mxu1 %vm1007_vm2, %v2477_v5  ;;  %2129 = vst.msk [vmem:[%s3370_s22 + $0x1c] sm:$0xf] %vm2121_vm3, %v2000_v19  ;;  %v1237_v22 = vadd.f32 %v3357_v2, %v1236_v20  ;;  %2960 = vmatmul.msk.bf16.gmra.mxu3 %vm1007_vm2, %v2741_v17  ;;  %v1723_v23 = vadd.f32 %v3407_v58, %v1394_v16  ;;  %v3078_v19 = vld [vmem:[%s3238_s27 + $0x304] sm:$0xf]  ;;  %v2480_v20 = vld [vmem:[%s3238_s27 + $0xe0] sm:$0xf] }
  0xeb   : > { %v2493_v16 = vor.u32 %v3012_v12, %v2490_v14 }
  0xec   : > { %v1566_v24 = vadd.f32 %v1565_v36, %v1237_v22  ;;  %1275 = vmatmul.bf16.gmra.mxu0 %v2465_v39  ;;  %v1936_v25 = vmax.f32 %v1723_v23, 0.0  ;;  %1435 = vmatmul.bf16.gmra.mxu2 %v2721_v21  ;;  %v3011_v21 = vld [vmem:[%s3238_s27 + $0xe4] sm:$0xf0] }
  0xed   : > { %v3476_v27 = vpop.f32.mrf.mxu3 }
  0xee   : > { %v1873_v28 = vmax.f32 %v1566_v24, 0.0  ;;  %v2064_v30 = vpack.c.bf16 %v1936_v25, %v1936_v25  ;;  %v2736_v25 = vld [vmem:[%s3238_s27 + $0x2e0] sm:$0xf] }
  0xef   : > { %v1572_v29 = vpop.f32.mrf.mxu1  ;;  %v1396_v32 = vpop.f32.mrf.mxu2 }
  0xf0   : > { %v2001_v31 = vpack.c.bf16 %v1873_v28, %v1873_v28  ;;  %2193 = vst.msk [vmem:[%s3370_s22 + $0x11c] sm:$0xf] %vm2121_vm3, %v2064_v30  ;;  %v1397_v58 = vadd.f32 %v3357_v2, %v1396_v32  ;;  %v3075_v28 = vld [vmem:[%s3238_s27 + $0x2e4] sm:$0xf0]  ;;  %v2757_v30 = vor.u32 %v3078_v19, %v2754_v0 }
  0xf1   : > { %v1238_v35 = vpop.f32.mrf.mxu0 }
  0xf2   : > { %2130 = vst.msk [vmem:[%s3370_s22 + $0x20] sm:$0xf] %vm2121_vm3, %v2001_v31  ;;  %v1239_v36 = vadd.f32 %v3357_v2, %v1238_v35  ;;  %v1726_v40 = vadd.f32 %v3420_v13, %v1397_v58  ;;  %v2473_v13 = vor.u32 %v3009_v46, %v2472_v45 }
  0xf4   : > { %v1568_v42 = vadd.f32 %v1567_v53, %v1239_v36  ;;  %v1937_v11 = vmax.f32 %v1726_v40, 0.0  ;;  %v2737_v36 = vor.u32 %v3075_v28, %v2736_v25  ;;  %v3016_v25 = vld [vmem:[%s3238_s27 + $0x114] sm:$0xf]  ;;  %v2506_v28 = vld [vmem:[%s3238_s27 + $0x118] sm:$0xf0] }
  0xf5   : > { %v3491_v47 = vpop.f32.mrf.mxu3 }
  0xf6   : > { %v1874_v48 = vmax.f32 %v1568_v42, 0.0  ;;  %v2065_v56 = vpack.c.bf16 %v1937_v11, %v1937_v11 }
  0xf7   : > { %v1575_v49 = vpop.f32.mrf.mxu1  ;;  %v1398_v26 = vpop.f32.mrf.mxu2 }
  0xf8   : > { %v2002_v57 = vpack.c.bf16 %v1874_v48, %v1874_v48  ;;  %2194 = vst.msk [vmem:[%s3370_s22 + $0x120] sm:$0xf] %vm2121_vm3, %v2065_v56  ;;  %v1399_v53 = vadd.f32 %v3357_v2, %v1398_v26  ;;  %v2762_v26 = vld [vmem:[%s3238_s27 + $0x318] sm:$0xf0] }
  0xf9   : > { %v1241_v59 = vpop.f32.mrf.mxu0 }
  0xfa   : > { %2928 = vmatmul.msk.bf16.gmra.mxu1 %vm1007_vm2, %v2485_v41  ;;  %2131 = vst.msk [vmem:[%s3370_s22 + $0x24] sm:$0xf] %vm2121_vm3, %v2002_v57  ;;  %v1242_v61 = vadd.f32 %v3357_v2, %v1241_v59  ;;  %2961 = vmatmul.msk.bf16.gmra.mxu3 %vm1007_vm2, %v2749_v54  ;;  %v1728_v62 = vadd.f32 %v3435_v34, %v1399_v53  ;;  %v3080_v57 = vld [vmem:[%s3238_s27 + $0x314] sm:$0xf]  ;;  %v2488_v59 = vld [vmem:[%s3238_s27 + $0xf0] sm:$0xf] }
  0xfb   : > { %v2501_v53 = vor.u32 %v3014_v50, %v2498_v52 }
  0xfc   : > { %v1571_v63 = vadd.f32 %v1570_v10, %v1242_v61  ;;  %1280 = vmatmul.bf16.gmra.mxu0 %v2473_v13  ;;  %v1938_v1 = vmax.f32 %v1728_v62, 0.0  ;;  %1440 = vmatmul.bf16.gmra.mxu2 %v2729_v60  ;;  %v3013_v60 = vld [vmem:[%s3238_s27 + $0xf4] sm:$0xf0] }
  0xfd   : > { %v3504_v3 = vpop.f32.mrf.mxu3 }
  0xfe   : > { %v1875_v4 = vmax.f32 %v1571_v63, 0.0  ;;  %v2066_v5 = vpack.c.bf16 %v1938_v1, %v1938_v1  ;;  %v2744_v1 = vld [vmem:[%s3238_s27 + $0x2f0] sm:$0xf] }
  0xff   : > { %v1577_v55 = vpop.f32.mrf.mxu1  ;;  %v1401_v7 = vpop.f32.mrf.mxu2 }
 0x100   : > { %v2003_v6 = vpack.c.bf16 %v1875_v4, %v1875_v4  ;;  %2195 = vst.msk [vmem:[%s3370_s22 + $0x124] sm:$0xf] %vm2121_vm3, %v2066_v5  ;;  %v1402_v34 = vadd.f32 %v3357_v2, %v1401_v7  ;;  %v3077_v4 = vld [vmem:[%s3238_s27 + $0x2f4] sm:$0xf0]  ;;  %v2765_v5 = vor.u32 %v3080_v57, %v2762_v26 }
 0x101   : > { %v1243_v9 = vpop.f32.mrf.mxu0 }
 0x102   : > { %2132 = vst.msk [vmem:[%s3370_s22 + $0x28] sm:$0xf] %vm2121_vm3, %v2003_v6  ;;  %v1244_v10 = vadd.f32 %v3357_v2, %v1243_v9  ;;  %v1731_v17 = vadd.f32 %v3448_v51, %v1402_v34  ;;  %v2481_v51 = vor.u32 %v3011_v21, %v2480_v20 }
 0x104   : > { %v1573_v18 = vadd.f32 %v1572_v29, %v1244_v10  ;;  %v1939_v39 = vmax.f32 %v1731_v17, 0.0  ;;  %v2745_v10 = vor.u32 %v3077_v4, %v2744_v1  ;;  %v3018_v1 = vld [vmem:[%s3238_s27 + $0x124] sm:$0xf]  ;;  %v2514_v4 = vld [vmem:[%s3238_s27 + $0x128] sm:$0xf0] }
 0x105   : > { %v3519_v22 = vpop.f32.mrf.mxu3 }
 0x106   : > { %v1876_v23 = vmax.f32 %v1573_v18, 0.0  ;;  %v2067_v31 = vpack.c.bf16 %v1939_v39, %v1939_v39 }
 0x107   : > { %v1580_v24 = vpop.f32.mrf.mxu1  ;;  %v1403_v58 = vpop.f32.mrf.mxu2 }
 0x108   : > { %v2004_v32 = vpack.c.bf16 %v1876_v23, %v1876_v23  ;;  %2196 = vst.msk [vmem:[%s3370_s22 + $0x128] sm:$0xf] %vm2121_vm3, %v2067_v31  ;;  %v1404_v29 = vadd.f32 %v3357_v2, %v1403_v58  ;;  %v2770_v58 = vld [vmem:[%s3238_s27 + $0x328] sm:$0xf0] }
 0x109   : > { %v1246_v35 = vpop.f32.mrf.mxu0 }
 0x10a   : > { %2929 = vmatmul.msk.bf16.gmra.mxu1 %vm1007_vm2, %v2493_v16  ;;  %2133 = vst.msk [vmem:[%s3370_s22 + $0x2c] sm:$0xf] %vm2121_vm3, %v2004_v32  ;;  %v1247_v37 = vadd.f32 %v3357_v2, %v1246_v35  ;;  %2962 = vmatmul.msk.bf16.gmra.mxu3 %vm1007_vm2, %v2757_v30  ;;  %v1733_v38 = vadd.f32 %v3463_v8, %v1404_v29  ;;  %v3082_v32 = vld [vmem:[%s3238_s27 + $0x324] sm:$0xf]  ;;  %v2496_v35 = vld [vmem:[%s3238_s27 + $0x100] sm:$0xf] }
 0x10b   : > { %v2509_v29 = vor.u32 %v3016_v25, %v2506_v28 }
 0x10c   : > { %v1576_v40 = vadd.f32 %v1575_v49, %v1247_v37  ;;  %1285 = vmatmul.bf16.gmra.mxu0 %v2481_v51  ;;  %v1940_v42 = vmax.f32 %v1733_v38, 0.0  ;;  %1445 = vmatmul.bf16.gmra.mxu2 %v2737_v36  ;;  %v3015_v36 = vld [vmem:[%s3238_s27 + $0x104] sm:$0xf0] }
 0x10d   : > { %v3532_v43 = vpop.f32.mrf.mxu3 }
 0x10e   : > { %v1877_v44 = vmax.f32 %v1576_v40, 0.0  ;;  %v2068_v41 = vpack.c.bf16 %v1940_v42, %v1940_v42  ;;  %v2752_v42 = vld [vmem:[%s3238_s27 + $0x300] sm:$0xf] }
 0x10f   : > { %v1582_v11 = vpop.f32.mrf.mxu1  ;;  %v1406_v46 = vpop.f32.mrf.mxu2 }
 0x110   : > { %v2005_v45 = vpack.c.bf16 %v1877_v44, %v1877_v44  ;;  %2197 = vst.msk [vmem:[%s3370_s22 + $0x12c] sm:$0xf] %vm2121_vm3, %v2068_v41  ;;  %v1407_v8 = vadd.f32 %v3357_v2, %v1406_v46  ;;  %v3079_v44 = vld [vmem:[%s3238_s27 + $0x304] sm:$0xf0]  ;;  %v2773_v41 = vor.u32 %v3082_v32, %v2770_v58 }
 0x111   : > { %v1248_v48 = vpop.f32.mrf.mxu0 }
 0x112   : > { %2134 = vst.msk [vmem:[%s3370_s22 + $0x30] sm:$0xf] %vm2121_vm3, %v2005_v45  ;;  %v1249_v49 = vadd.f32 %v3357_v2, %v1248_v48  ;;  %v1736_v54 = vadd.f32 %v3476_v27, %v1407_v8  ;;  %v2489_v27 = vor.u32 %v3013_v60, %v2488_v59 }
 0x114   : > { %v1578_v56 = vadd.f32 %v1577_v55, %v1249_v49  ;;  %v1941_v13 = vmax.f32 %v1736_v54, 0.0  ;;  %v2753_v49 = vor.u32 %v3079_v44, %v2752_v42  ;;  %v3020_v42 = vld [vmem:[%s3238_s27 + $0x134] sm:$0xf]  ;;  %v2522_v44 = vld [vmem:[%s3238_s27 + $0x138] sm:$0xf0] }
 0x115   : > { %v3547_v61 = vpop.f32.mrf.mxu3 }
 0x116   : > { %v1878_v62 = vmax.f32 %v1578_v56, 0.0  ;;  %v2069_v6 = vpack.c.bf16 %v1941_v13, %v1941_v13 }
 0x117   : > { %v1585_v63 = vpop.f32.mrf.mxu1  ;;  %v1408_v34 = vpop.f32.mrf.mxu2 }
 0x118   : > { %v2006_v7 = vpack.c.bf16 %v1878_v62, %v1878_v62  ;;  %2198 = vst.msk [vmem:[%s3370_s22 + $0x130] sm:$0xf] %vm2121_vm3, %v2069_v6  ;;  %v1409_v55 = vadd.f32 %v3357_v2, %v1408_v34  ;;  %v2778_v34 = vld [vmem:[%s3238_s27 + $0x338] sm:$0xf0] }
 0x119   : > { %v1251_v9 = vpop.f32.mrf.mxu0 }
 0x11a   : > { %2930 = vmatmul.msk.bf16.gmra.mxu1 %vm1007_vm2, %v2501_v53  ;;  %2135 = vst.msk [vmem:[%s3370_s22 + $0x34] sm:$0xf] %vm2121_vm3, %v2006_v7  ;;  %v1252_v12 = vadd.f32 %v3357_v2, %v1251_v9  ;;  %2963 = vmatmul.msk.bf16.gmra.mxu3 %vm1007_vm2, %v2765_v5  ;;  %v1738_v14 = vadd.f32 %v3491_v47, %v1409_v55  ;;  %v3084_v7 = vld [vmem:[%s3238_s27 + $0x334] sm:$0xf]  ;;  %v2504_v9 = vld [vmem:[%s3238_s27 + $0x110] sm:$0xf] }
 0x11b   : > { %v2517_v55 = vor.u32 %v3018_v1, %v2514_v4 }
 0x11c   : > { %v1581_v17 = vadd.f32 %v1580_v24, %v1252_v12  ;;  %1290 = vmatmul.bf16.gmra.mxu0 %v2489_v27  ;;  %v1942_v18 = vmax.f32 %v1738_v14, 0.0  ;;  %1450 = vmatmul.bf16.gmra.mxu2 %v2745_v10  ;;  %v3017_v10 = vld [vmem:[%s3238_s27 + $0x114] sm:$0xf0] }
 0x11d   : > { %v3560_v19 = vpop.f32.mrf.mxu3 }
 0x11e   : > { %v1879_v0 = vmax.f32 %v1581_v17, 0.0  ;;  %v2070_v16 = vpack.c.bf16 %v1942_v18, %v1942_v18  ;;  %v2760_v18 = vld [vmem:[%s3238_s27 + $0x310] sm:$0xf] }
 0x11f   : > { %v1587_v39 = vpop.f32.mrf.mxu1  ;;  %v1411_v21 = vpop.f32.mrf.mxu2 }
 0x120   : > { %v2007_v20 = vpack.c.bf16 %v1879_v0, %v1879_v0  ;;  %2199 = vst.msk [vmem:[%s3370_s22 + $0x134] sm:$0xf] %vm2121_vm3, %v2070_v16  ;;  %v1412_v47 = vadd.f32 %v3357_v2, %v1411_v21  ;;  %v3081_v0 = vld [vmem:[%s3238_s27 + $0x314] sm:$0xf0]  ;;  %v2781_v16 = vor.u32 %v3084_v7, %v2778_v34 }
 0x121   : > { %v1253_v23 = vpop.f32.mrf.mxu0 }
 0x122   : > { %2136 = vst.msk [vmem:[%s3370_s22 + $0x38] sm:$0xf] %vm2121_vm3, %v2007_v20  ;;  %v1254_v24 = vadd.f32 %v3357_v2, %v1253_v23  ;;  %v1741_v30 = vadd.f32 %v3504_v3, %v1412_v47  ;;  %v2497_v3 = vor.u32 %v3015_v36, %v2496_v35 }
 0x124   : > { %v1583_v31 = vadd.f32 %v1582_v11, %v1254_v24  ;;  %v1943_v51 = vmax.f32 %v1741_v30, 0.0  ;;  %v2761_v24 = vor.u32 %v3081_v0, %v2760_v18  ;;  %v3022_v18 = vld [vmem:[%s3238_s27 + $0x144] sm:$0xf]  ;;  %v2530_v0 = vld [vmem:[%s3238_s27 + $0x148] sm:$0xf0] }
 0x125   : > { %v3575_v37 = vpop.f32.mrf.mxu3 }
 0x126   : > { %v1880_v38 = vmax.f32 %v1583_v31, 0.0  ;;  %v2071_v45 = vpack.c.bf16 %v1943_v51, %v1943_v51 }
 0x127   : > { %v1590_v40 = vpop.f32.mrf.mxu1  ;;  %v1413_v8 = vpop.f32.mrf.mxu2 }
 0x128   : > { %v2008_v46 = vpack.c.bf16 %v1880_v38, %v1880_v38  ;;  %2200 = vst.msk [vmem:[%s3370_s22 + $0x138] sm:$0xf] %vm2121_vm3, %v2071_v45  ;;  %v1414_v11 = vadd.f32 %v3357_v2, %v1413_v8  ;;  %v2786_v8 = vld [vmem:[%s3238_s27 + $0x348] sm:$0xf0] }
 0x129   : > { %v1256_v48 = vpop.f32.mrf.mxu0 }
 0x12a   : > { %2931 = vmatmul.msk.bf16.gmra.mxu1 %vm1007_vm2, %v2509_v29  ;;  %2137 = vst.msk [vmem:[%s3370_s22 + $0x3c] sm:$0xf] %vm2121_vm3, %v2008_v46  ;;  %v1257_v50 = vadd.f32 %v3357_v2, %v1256_v48  ;;  %2964 = vmatmul.msk.bf16.gmra.mxu3 %vm1007_vm2, %v2773_v41  ;;  %v1743_v52 = vadd.f32 %v3519_v22, %v1414_v11  ;;  %v3086_v46 = vld [vmem:[%s3238_s27 + $0x344] sm:$0xf]  ;;  %v2512_v48 = vld [vmem:[%s3238_s27 + $0x120] sm:$0xf] }
 0x12b   : > { %v2525_v11 = vor.u32 %v3020_v42, %v2522_v44 }
 0x12c   : > { %v1586_v54 = vadd.f32 %v1585_v63, %v1257_v50  ;;  %1295 = vmatmul.bf16.gmra.mxu0 %v2497_v3  ;;  %v1944_v56 = vmax.f32 %v1743_v52, 0.0  ;;  %1455 = vmatmul.bf16.gmra.mxu2 %v2753_v49  ;;  %v3019_v49 = vld [vmem:[%s3238_s27 + $0x124] sm:$0xf0] }
 0x12d   : > { %v3588_v57 = vpop.f32.mrf.mxu3 }
 0x12e   : > { %v1881_v26 = vmax.f32 %v1586_v54, 0.0  ;;  %v2072_v53 = vpack.c.bf16 %v1944_v56, %v1944_v56  ;;  %v2768_v56 = vld [vmem:[%s3238_s27 + $0x320] sm:$0xf] }
 0x12f   : > { %v1592_v13 = vpop.f32.mrf.mxu1  ;;  %v1416_v60 = vpop.f32.mrf.mxu2 }
 0x130   : > { %v2009_v59 = vpack.c.bf16 %v1881_v26, %v1881_v26  ;;  %2201 = vst.msk [vmem:[%s3370_s22 + $0x13c] sm:$0xf] %vm2121_vm3, %v2072_v53  ;;  %v1417_v22 = vadd.f32 %v3357_v2, %v1416_v60  ;;  %v3083_v26 = vld [vmem:[%s3238_s27 + $0x324] sm:$0xf0]  ;;  %v2789_v53 = vor.u32 %v3086_v46, %v2786_v8 }
 0x131   : > { %v1258_v62 = vpop.f32.mrf.mxu0 }
 0x132   : > { %2138 = vst.msk [vmem:[%s3370_s22 + $0x40] sm:$0xf] %vm2121_vm3, %v2009_v59  ;;  %v1259_v63 = vadd.f32 %v3357_v2, %v1258_v62  ;;  %v1746_v5 = vadd.f32 %v3532_v43, %v1417_v22  ;;  %v2505_v43 = vor.u32 %v3017_v10, %v2504_v9 }
 0x134   : > { %v1588_v6 = vadd.f32 %v1587_v39, %v1259_v63  ;;  %v1945_v27 = vmax.f32 %v1746_v5, 0.0  ;;  %v2769_v63 = vor.u32 %v3083_v26, %v2768_v56  ;;  %v3024_v56 = vld [vmem:[%s3238_s27 + $0x154] sm:$0xf]  ;;  %v2538_v26 = vld [vmem:[%s3238_s27 + $0x158] sm:$0xf0] }
 0x135   : > { %v3603_v12 = vpop.f32.mrf.mxu3 }
 0x136   : > { %v1882_v14 = vmax.f32 %v1588_v6, 0.0  ;;  %v2073_v20 = vpack.c.bf16 %v1945_v27, %v1945_v27 }
 0x137   : > { %v1595_v17 = vpop.f32.mrf.mxu1  ;;  %v1418_v47 = vpop.f32.mrf.mxu2 }
 0x138   : > { %v2010_v21 = vpack.c.bf16 %v1882_v14, %v1882_v14  ;;  %2202 = vst.msk [vmem:[%s3370_s22 + $0x140] sm:$0xf] %vm2121_vm3, %v2073_v20  ;;  %v1419_v39 = vadd.f32 %v3357_v2, %v1418_v47  ;;  %v2794_v47 = vld [vmem:[%s3238_s27 + $0x358] sm:$0xf0] }
 0x139   : > { %v1261_v23 = vpop.f32.mrf.mxu0 }
 0x13a   : > { %2932 = vmatmul.msk.bf16.gmra.mxu1 %vm1007_vm2, %v2517_v55  ;;  %2139 = vst.msk [vmem:[%s3370_s22 + $0x44] sm:$0xf] %vm2121_vm3, %v2010_v21  ;;  %v1262_v25 = vadd.f32 %v3357_v2, %v1261_v23  ;;  %2965 = vmatmul.msk.bf16.gmra.mxu3 %vm1007_vm2, %v2781_v16  ;;  %v1748_v28 = vadd.f32 %v3547_v61, %v1419_v39  ;;  %v3088_v21 = vld [vmem:[%s3238_s27 + $0x354] sm:$0xf]  ;;  %v2520_v23 = vld [vmem:[%s3238_s27 + $0x130] sm:$0xf] }
 0x13b   : > { %v2533_v39 = vor.u32 %v3022_v18, %v2530_v0 }
 0x13c   : > { %v1591_v30 = vadd.f32 %v1590_v40, %v1262_v25  ;;  %1300 = vmatmul.bf16.gmra.mxu0 %v2505_v43  ;;  %v1946_v31 = vmax.f32 %v1748_v28, 0.0  ;;  %1460 = vmatmul.bf16.gmra.mxu2 %v2761_v24  ;;  %v3021_v24 = vld [vmem:[%s3238_s27 + $0x134] sm:$0xf0] }
 0x13d   : > { %v3616_v32 = vpop.f32.mrf.mxu3 }
 0x13e   : > { %v1883_v58 = vmax.f32 %v1591_v30, 0.0  ;;  %v2074_v29 = vpack.c.bf16 %v1946_v31, %v1946_v31  ;;  %v2776_v31 = vld [vmem:[%s3238_s27 + $0x330] sm:$0xf] }
 0x13f   : > { %v1597_v51 = vpop.f32.mrf.mxu1  ;;  %v1421_v36 = vpop.f32.mrf.mxu2 }
 0x140   : > { %v2011_v35 = vpack.c.bf16 %v1883_v58, %v1883_v58  ;;  %2203 = vst.msk [vmem:[%s3370_s22 + $0x144] sm:$0xf] %vm2121_vm3, %v2074_v29  ;;  %v1422_v61 = vadd.f32 %v3357_v2, %v1421_v36  ;;  %v3085_v58 = vld [vmem:[%s3238_s27 + $0x334] sm:$0xf0]  ;;  %v2797_v29 = vor.u32 %v3088_v21, %v2794_v47 }
 0x141   : > { %v1263_v38 = vpop.f32.mrf.mxu0 }
 0x142   : > { %2140 = vst.msk [vmem:[%s3370_s22 + $0x48] sm:$0xf] %vm2121_vm3, %v2011_v35  ;;  %v1264_v40 = vadd.f32 %v3357_v2, %v1263_v38  ;;  %v1751_v41 = vadd.f32 %v3560_v19, %v1422_v61  ;;  %v2513_v19 = vor.u32 %v3019_v49, %v2512_v48 }
 0x144   : > { %v1593_v45 = vadd.f32 %v1592_v13, %v1264_v40  ;;  %v1947_v3 = vmax.f32 %v1751_v41, 0.0  ;;  %v2777_v40 = vor.u32 %v3085_v58, %v2776_v31  ;;  %v3026_v31 = vld [vmem:[%s3238_s27 + $0x164] sm:$0xf]  ;;  %v2546_v58 = vld [vmem:[%s3238_s27 + $0x168] sm:$0xf0] }
 0x145   : > { %v3631_v50 = vpop.f32.mrf.mxu3 }
 0x146   : > { %v1884_v52 = vmax.f32 %v1593_v45, 0.0  ;;  %v2075_v59 = vpack.c.bf16 %v1947_v3, %v1947_v3 }
 0x147   : > { %v1600_v54 = vpop.f32.mrf.mxu1  ;;  %v1423_v22 = vpop.f32.mrf.mxu2 }
 0x148   : > { %v2012_v60 = vpack.c.bf16 %v1884_v52, %v1884_v52  ;;  %2204 = vst.msk [vmem:[%s3370_s22 + $0x148] sm:$0xf] %vm2121_vm3, %v2075_v59  ;;  %v1424_v13 = vadd.f32 %v3357_v2, %v1423_v22  ;;  %v2802_v22 = vld [vmem:[%s3238_s27 + $0x368] sm:$0xf0] }
 0x149   : > { %v1266_v62 = vpop.f32.mrf.mxu0 }
 0x14a   : > { %2933 = vmatmul.msk.bf16.gmra.mxu1 %vm1007_vm2, %v2525_v11  ;;  %2141 = vst.msk [vmem:[%s3370_s22 + $0x4c] sm:$0xf] %vm2121_vm3, %v2012_v60  ;;  %v1267_v1 = vadd.f32 %v3357_v2, %v1266_v62  ;;  %2966 = vmatmul.msk.bf16.gmra.mxu3 %vm1007_vm2, %v2789_v53  ;;  %v1753_v4 = vadd.f32 %v3575_v37, %v1424_v13  ;;  %v3090_v60 = vld [vmem:[%s3238_s27 + $0x364] sm:$0xf]  ;;  %v2528_v62 = vld [vmem:[%s3238_s27 + $0x140] sm:$0xf] }
 0x14b   : > { %v2541_v13 = vor.u32 %v3024_v56, %v2538_v26 }
 0x14c   : > { %v1596_v5 = vadd.f32 %v1595_v17, %v1267_v1  ;;  %1305 = vmatmul.bf16.gmra.mxu0 %v2513_v19  ;;  %v1948_v6 = vmax.f32 %v1753_v4, 0.0  ;;  %1465 = vmatmul.bf16.gmra.mxu2 %v2769_v63  ;;  %v3023_v63 = vld [vmem:[%s3238_s27 + $0x144] sm:$0xf0] }
 0x14d   : > { %v3644_v7 = vpop.f32.mrf.mxu3 }
 0x14e   : > { %v1885_v34 = vmax.f32 %v1596_v5, 0.0  ;;  %v2076_v55 = vpack.c.bf16 %v1948_v6, %v1948_v6  ;;  %v2784_v6 = vld [vmem:[%s3238_s27 + $0x340] sm:$0xf] }
 0x14f   : > { %v1602_v27 = vpop.f32.mrf.mxu1  ;;  %v1426_v10 = vpop.f32.mrf.mxu2 }
 0x150   : > { %v2013_v9 = vpack.c.bf16 %v1885_v34, %v1885_v34  ;;  %2205 = vst.msk [vmem:[%s3370_s22 + $0x14c] sm:$0xf] %vm2121_vm3, %v2076_v55  ;;  %v1427_v37 = vadd.f32 %v3357_v2, %v1426_v10  ;;  %v3087_v34 = vld [vmem:[%s3238_s27 + $0x344] sm:$0xf0] }
 0x151   : > { %v1268_v14 = vpop.f32.mrf.mxu0 }
 0x152   : > { %2142 = vst.msk [vmem:[%s3370_s22 + $0x50] sm:$0xf] %vm2121_vm3, %v2013_v9  ;;  %v1269_v17 = vadd.f32 %v3357_v2, %v1268_v14  ;;  %v1756_v16 = vadd.f32 %v3588_v57, %v1427_v37  ;;  %v2521_v57 = vor.u32 %v3021_v24, %v2520_v23 }
 0x154   : > { %v1598_v20 = vadd.f32 %v1597_v51, %v1269_v17  ;;  %v1949_v43 = vmax.f32 %v1756_v16, 0.0  ;;  %v2785_v17 = vor.u32 %v3087_v34, %v2784_v6  ;;  %v3028_v6 = vld [vmem:[%s3238_s27 + $0x174] sm:$0xf]  ;;  %v2554_v34 = vld [vmem:[%s3238_s27 + $0x178] sm:$0xf0] }
 0x155   : > { %v3659_v25 = vpop.f32.mrf.mxu3 }
 0x156   : > { %v1886_v28 = vmax.f32 %v1598_v20, 0.0  ;;  %v2077_v35 = vpack.c.bf16 %v1949_v43, %v1949_v43 }
 0x157   : > { %v1605_v30 = vpop.f32.mrf.mxu1  ;;  %v1428_v61 = vpop.f32.mrf.mxu2 }
 0x158   : > { %v2014_v36 = vpack.c.bf16 %v1886_v28, %v1886_v28  ;;  %2206 = vst.msk [vmem:[%s3370_s22 + $0x150] sm:$0xf] %vm2121_vm3, %v2077_v35  ;;  %v1429_v51 = vadd.f32 %v3357_v2, %v1428_v61  ;;  %v2810_v61 = vld [vmem:[%s3238_s27 + $0x378] sm:$0xf0] }
 0x159   : > { %v1271_v38 = vpop.f32.mrf.mxu0 }
 0x15a   : > { %2934 = vmatmul.msk.bf16.gmra.mxu1 %vm1007_vm2, %v2533_v39  ;;  %2143 = vst.msk [vmem:[%s3370_s22 + $0x54] sm:$0xf] %vm2121_vm3, %v2014_v36  ;;  %v1272_v42 = vadd.f32 %v3357_v2, %v1271_v38  ;;  %2967 = vmatmul.msk.bf16.gmra.mxu3 %vm1007_vm2, %v2797_v29  ;;  %v1758_v44 = vadd.f32 %v3603_v12, %v1429_v51  ;;  %v3092_v36 = vld [vmem:[%s3238_s27 + $0x374] sm:$0xf]  ;;  %v2536_v38 = vld [vmem:[%s3238_s27 + $0x150] sm:$0xf] }
 0x15b   : > { %v2549_v51 = vor.u32 %v3026_v31, %v2546_v58 }
 0x15c   : > { %v1601_v41 = vadd.f32 %v1600_v54, %v1272_v42  ;;  %1310 = vmatmul.bf16.gmra.mxu0 %v2521_v57  ;;  %v1950_v45 = vmax.f32 %v1758_v44, 0.0  ;;  %1470 = vmatmul.bf16.gmra.mxu2 %v2777_v40  ;;  %v3025_v40 = vld [vmem:[%s3238_s27 + $0x154] sm:$0xf0] }
 0x15d   : > { %v3672_v46 = vpop.f32.mrf.mxu3 }
 0x15e   : > { %v1887_v8 = vmax.f32 %v1601_v41, 0.0  ;;  %v2078_v11 = vpack.c.bf16 %v1950_v45, %v1950_v45  ;;  %v2792_v45 = vld [vmem:[%s3238_s27 + $0x350] sm:$0xf] }
 0x15f   : > { %v1607_v3 = vpop.f32.mrf.mxu1  ;;  %v1431_v49 = vpop.f32.mrf.mxu2 }
 0x160   : > { %v2015_v48 = vpack.c.bf16 %v1887_v8, %v1887_v8  ;;  %2207 = vst.msk [vmem:[%s3370_s22 + $0x154] sm:$0xf] %vm2121_vm3, %v2078_v11  ;;  %v1432_v12 = vadd.f32 %v3357_v2, %v1431_v49  ;;  %v3089_v8 = vld [vmem:[%s3238_s27 + $0x354] sm:$0xf0]  ;;  %v2813_v11 = vor.u32 %v3092_v36, %v2810_v61 }
 0x161   : > { %v1273_v52 = vpop.f32.mrf.mxu0 }
 0x162   : > { %2144 = vst.msk [vmem:[%s3370_s22 + $0x58] sm:$0xf] %vm2121_vm3, %v2015_v48  ;;  %v1274_v54 = vadd.f32 %v3357_v2, %v1273_v52  ;;  %v1761_v53 = vadd.f32 %v3616_v32, %v1432_v12  ;;  %v2805_v2 = vor.u32 %v3090_v60, %v2802_v22  ;;  %v2529_v32 = vor.u32 %v3023_v63, %v2528_v62 }
 0x164   : > { %v1603_v59 = vadd.f32 %v1602_v27, %v1274_v54  ;;  %v1951_v19 = vmax.f32 %v1761_v53, 0.0  ;;  %v3696_v27 = vld [vmem:[%s4141_s2] ss:$0 sm:$0xff]  ;;  %v2793_v54 = vor.u32 %v3089_v8, %v2792_v45  ;;  %v3030_v45 = vld [vmem:[%s3238_s27 + $0x184] sm:$0xf] }
 0x165   : > { %v3687_v1 = vpop.f32.mrf.mxu3  ;;  %v2562_v8 = vld [vmem:[%s3238_s27 + $0x188] sm:$0xf0] }
 0x166   : > { %v1888_v4 = vmax.f32 %v1603_v59, 0.0  ;;  %v2079_v55 = vpack.c.bf16 %v1951_v19, %v1951_v19 }
 0x167   : > { %v1610_v5 = vpop.f32.mrf.mxu1  ;;  %v1433_v10 = vpop.f32.mrf.mxu2 }
 0x168   : > { %v2016_v9 = vpack.c.bf16 %v1888_v4, %v1888_v4  ;;  %2208 = vst.msk [vmem:[%s3370_s22 + $0x158] sm:$0xf] %vm2121_vm3, %v2079_v55  ;;  %v1434_v37 = vadd.f32 %v3696_v27, %v1433_v10  ;;  %v2818_v10 = vld [vmem:[%s3238_s27 + $0x388] sm:$0xf0] }
 0x169   : > { %v1276_v14 = vpop.f32.mrf.mxu0 }
 0x16a   : > { %2935 = vmatmul.msk.bf16.gmra.mxu1 %vm1007_vm2, %v2541_v13  ;;  %2145 = vst.msk [vmem:[%s3370_s22 + $0x5c] sm:$0xf] %vm2121_vm3, %v2016_v9  ;;  %v1277_v18 = vadd.f32 %v3696_v27, %v1276_v14  ;;  %2968 = vmatmul.msk.bf16.gmra.mxu3 %vm1007_vm2, %v2805_v2  ;;  %v1763_v0 = vadd.f32 %v3631_v50, %v1434_v37  ;;  %v3094_v9 = vld [vmem:[%s3238_s27 + $0x384] sm:$0xf]  ;;  %v2544_v14 = vld [vmem:[%s3238_s27 + $0x160] sm:$0xf] }
 0x16b   : > { %v2557_v37 = vor.u32 %v3028_v6, %v2554_v34 }
 0x16c   : > { %v1606_v16 = vadd.f32 %v1605_v30, %v1277_v18  ;;  %1315 = vmatmul.bf16.gmra.mxu0 %v2529_v32  ;;  %v1952_v20 = vmax.f32 %v1763_v0, 0.0  ;;  %1475 = vmatmul.bf16.gmra.mxu2 %v2785_v17  ;;  %v3027_v17 = vld [vmem:[%s3238_s27 + $0x164] sm:$0xf0] }
 0x16d   : > { %v3705_v21 = vpop.f32.mrf.mxu3 }
 0x16e   : > { %v1889_v47 = vmax.f32 %v1606_v16, 0.0  ;;  %v2080_v39 = vpack.c.bf16 %v1952_v20, %v1952_v20  ;;  %v2800_v20 = vld [vmem:[%s3238_s27 + $0x360] sm:$0xf] }
 0x16f   : > { %v1612_v43 = vpop.f32.mrf.mxu1  ;;  %v1436_v24 = vpop.f32.mrf.mxu2 }
 0x170   : > { %v2017_v23 = vpack.c.bf16 %v1889_v47, %v1889_v47  ;;  %2209 = vst.msk [vmem:[%s3370_s22 + $0x15c] sm:$0xf] %vm2121_vm3, %v2080_v39  ;;  %v1437_v50 = vadd.f32 %v3696_v27, %v1436_v24  ;;  %v3091_v47 = vld [vmem:[%s3238_s27 + $0x364] sm:$0xf0]  ;;  %v2821_v39 = vor.u32 %v3094_v9, %v2818_v10 }
 0x171   : > { %v1278_v28 = vpop.f32.mrf.mxu0 }
 0x172   : > { %2146 = vst.msk [vmem:[%s3370_s22 + $0x60] sm:$0xf] %vm2121_vm3, %v2017_v23  ;;  %v1279_v30 = vadd.f32 %v3696_v27, %v1278_v28  ;;  %v1766_v29 = vadd.f32 %v3644_v7, %v1437_v50  ;;  %v2537_v7 = vor.u32 %v3025_v40, %v2536_v38 }
 0x174   : > { %v1608_v35 = vadd.f32 %v1607_v3, %v1279_v30  ;;  %v1953_v57 = vmax.f32 %v1766_v29, 0.0  ;;  %v2801_v30 = vor.u32 %v3091_v47, %v2800_v20  ;;  %v3032_v20 = vld [vmem:[%s3238_s27 + $0x194] sm:$0xf]  ;;  %v2570_v47 = vld [vmem:[%s3238_s27 + $0x198] sm:$0xf0] }
 0x175   : > { %v3720_v42 = vpop.f32.mrf.mxu3 }
 0x176   : > { %v1890_v44 = vmax.f32 %v1608_v35, 0.0  ;;  %v2081_v48 = vpack.c.bf16 %v1953_v57, %v1953_v57 }
 0x177   : > { %v1615_v41 = vpop.f32.mrf.mxu1  ;;  %v1438_v12 = vpop.f32.mrf.mxu2 }
 0x178   : > { %v2018_v49 = vpack.c.bf16 %v1890_v44, %v1890_v44  ;;  %2210 = vst.msk [vmem:[%s3370_s22 + $0x160] sm:$0xf] %vm2121_vm3, %v2081_v48  ;;  %v1439_v3 = vadd.f32 %v3696_v27, %v1438_v12  ;;  %v2826_v12 = vld [vmem:[%s3238_s27 + $0x398] sm:$0xf0] }
 0x179   : > { %v1281_v52 = vpop.f32.mrf.mxu0 }
 0x17a   : > { %2936 = vmatmul.msk.bf16.gmra.mxu1 %vm1007_vm2, %v2549_v51  ;;  %2147 = vst.msk [vmem:[%s3370_s22 + $0x64] sm:$0xf] %vm2121_vm3, %v2018_v49  ;;  %v1282_v56 = vadd.f32 %v3696_v27, %v1281_v52  ;;  %2969 = vmatmul.msk.bf16.gmra.mxu3 %vm1007_vm2, %v2813_v11  ;;  %v1768_v26 = vadd.f32 %v3659_v25, %v1439_v3  ;;  %v3096_v49 = vld [vmem:[%s3238_s27 + $0x394] sm:$0xf]  ;;  %v2552_v52 = vld [vmem:[%s3238_s27 + $0x170] sm:$0xf] }
 0x17b   : > { %v2565_v3 = vor.u32 %v3030_v45, %v2562_v8 }
 0x17c   : > { %v1611_v53 = vadd.f32 %v1610_v5, %v1282_v56  ;;  %1320 = vmatmul.bf16.gmra.mxu0 %v2537_v7  ;;  %v1954_v59 = vmax.f32 %v1768_v26, 0.0  ;;  %1480 = vmatmul.bf16.gmra.mxu2 %v2793_v54  ;;  %v3029_v54 = vld [vmem:[%s3238_s27 + $0x174] sm:$0xf0] }
 0x17d   : > { %v3733_v60 = vpop.f32.mrf.mxu3 }
 0x17e   : > { %v1891_v22 = vmax.f32 %v1611_v53, 0.0  ;;  %v2082_v13 = vpack.c.bf16 %v1954_v59, %v1954_v59  ;;  %v2808_v59 = vld [vmem:[%s3238_s27 + $0x370] sm:$0xf] }
 0x17f   : > { %v1617_v19 = vpop.f32.mrf.mxu1  ;;  %v1441_v63 = vpop.f32.mrf.mxu2 }
 0x180   : > { %v2019_v62 = vpack.c.bf16 %v1891_v22, %v1891_v22  ;;  %2211 = vst.msk [vmem:[%s3370_s22 + $0x164] sm:$0xf] %vm2121_vm3, %v2082_v13  ;;  %v1442_v25 = vadd.f32 %v3696_v27, %v1441_v63  ;;  %v3093_v22 = vld [vmem:[%s3238_s27 + $0x374] sm:$0xf0]  ;;  %v2829_v13 = vor.u32 %v3096_v49, %v2826_v12 }
 0x181   : > { %v1283_v4 = vpop.f32.mrf.mxu0 }
 0x182   : > { %2148 = vst.msk [vmem:[%s3370_s22 + $0x68] sm:$0xf] %vm2121_vm3, %v2019_v62  ;;  %v1284_v5 = vadd.f32 %v3696_v27, %v1283_v4  ;;  %v1771_v2 = vadd.f32 %v3672_v46, %v1442_v25  ;;  %v2545_v46 = vor.u32 %v3027_v17, %v2544_v14 }
 0x184   : > { %v1613_v55 = vadd.f32 %v1612_v43, %v1284_v5  ;;  %v1955_v32 = vmax.f32 %v1771_v2, 0.0  ;;  %v2809_v5 = vor.u32 %v3093_v22, %v2808_v59  ;;  %v3034_v59 = vld [vmem:[%s3238_s27 + $0x1a4] sm:$0xf]  ;;  %v2578_v22 = vld [vmem:[%s3238_s27 + $0x1a8] sm:$0xf0] }
 0x185   : > { %v3748_v18 = vpop.f32.mrf.mxu3 }
 0x186   : > { %v1892_v0 = vmax.f32 %v1613_v55, 0.0  ;;  %v2083_v23 = vpack.c.bf16 %v1955_v32, %v1955_v32 }
 0x187   : > { %v1620_v16 = vpop.f32.mrf.mxu1  ;;  %v1443_v50 = vpop.f32.mrf.mxu2 }
 0x188   : > { %v2020_v24 = vpack.c.bf16 %v1892_v0, %v1892_v0  ;;  %2212 = vst.msk [vmem:[%s3370_s22 + $0x168] sm:$0xf] %vm2121_vm3, %v2083_v23  ;;  %v1444_v43 = vadd.f32 %v3696_v27, %v1443_v50  ;;  %v2834_v50 = vld [vmem:[%s3238_s27 + $0x3a8] sm:$0xf0] }
 0x189   : > { %v1286_v28 = vpop.f32.mrf.mxu0 }
 0x18a   : > { %2937 = vmatmul.msk.bf16.gmra.mxu1 %vm1007_vm2, %v2557_v37  ;;  %2149 = vst.msk [vmem:[%s3370_s22 + $0x6c] sm:$0xf] %vm2121_vm3, %v2020_v24  ;;  %v1287_v31 = vadd.f32 %v3696_v27, %v1286_v28  ;;  %2970 = vmatmul.msk.bf16.gmra.mxu3 %vm1007_vm2, %v2821_v39  ;;  %v1773_v58 = vadd.f32 %v3687_v1, %v1444_v43  ;;  %v3098_v24 = vld [vmem:[%s3238_s27 + $0x3a4] sm:$0xf]  ;;  %v2560_v28 = vld [vmem:[%s3238_s27 + $0x180] sm:$0xf] }
 0x18b   : > { %v2573_v43 = vor.u32 %v3032_v20, %v2570_v47 }
 0x18c   : > { %v1616_v29 = vadd.f32 %v1615_v41, %v1287_v31  ;;  %1325 = vmatmul.bf16.gmra.mxu0 %v2545_v46  ;;  %v1956_v35 = vmax.f32 %v1773_v58, 0.0  ;;  %1485 = vmatmul.bf16.gmra.mxu2 %v2801_v30  ;;  %v3031_v30 = vld [vmem:[%s3238_s27 + $0x184] sm:$0xf0] }
 0x18d   : > { %v3761_v36 = vpop.f32.mrf.mxu3 }
 0x18e   : > { %v1893_v61 = vmax.f32 %v1616_v29, 0.0  ;;  %v2084_v51 = vpack.c.bf16 %v1956_v35, %v1956_v35  ;;  %v2816_v35 = vld [vmem:[%s3238_s27 + $0x380] sm:$0xf] }
 0x18f   : > { %v1622_v57 = vpop.f32.mrf.mxu1  ;;  %v1446_v40 = vpop.f32.mrf.mxu2 }
 0x190   : > { %v2021_v38 = vpack.c.bf16 %v1893_v61, %v1893_v61  ;;  %2213 = vst.msk [vmem:[%s3370_s22 + $0x16c] sm:$0xf] %vm2121_vm3, %v2084_v51  ;;  %v1447_v1 = vadd.f32 %v3696_v27, %v1446_v40  ;;  %v3095_v61 = vld [vmem:[%s3238_s27 + $0x384] sm:$0xf0]  ;;  %v2837_v51 = vor.u32 %v3098_v24, %v2834_v50 }
 0x191   : > { %v1288_v44 = vpop.f32.mrf.mxu0 }
 0x192   : > { %2150 = vst.msk [vmem:[%s3370_s22 + $0x70] sm:$0xf] %vm2121_vm3, %v2021_v38  ;;  %v1289_v41 = vadd.f32 %v3696_v27, %v1288_v44  ;;  %v1776_v11 = vadd.f32 %v3705_v21, %v1447_v1  ;;  %v2553_v21 = vor.u32 %v3029_v54, %v2552_v52 }
 0x194   : > { %v1618_v48 = vadd.f32 %v1617_v19, %v1289_v41  ;;  %v1957_v7 = vmax.f32 %v1776_v11, 0.0  ;;  %v2817_v41 = vor.u32 %v3095_v61, %v2816_v35  ;;  %v3036_v35 = vld [vmem:[%s3238_s27 + $0x1b4] sm:$0xf]  ;;  %v2586_v61 = vld [vmem:[%s3238_s27 + $0x1b8] sm:$0xf0] }
 0x195   : > { %v3776_v56 = vpop.f32.mrf.mxu3 }
 0x196   : > { %v1894_v26 = vmax.f32 %v1618_v48, 0.0  ;;  %v2085_v62 = vpack.c.bf16 %v1957_v7, %v1957_v7 }
 0x197   : > { %v1625_v53 = vpop.f32.mrf.mxu1  ;;  %v1448_v25 = vpop.f32.mrf.mxu2 }
 0x198   : > { %v2022_v63 = vpack.c.bf16 %v1894_v26, %v1894_v26  ;;  %2214 = vst.msk [vmem:[%s3370_s22 + $0x170] sm:$0xf] %vm2121_vm3, %v2085_v62  ;;  %v1449_v19 = vadd.f32 %v3696_v27, %v1448_v25  ;;  %v2842_v25 = vld [vmem:[%s3238_s27 + $0x3b8] sm:$0xf0] }
 0x199   : > { %v1291_v4 = vpop.f32.mrf.mxu0 }
 0x19a   : > { %2938 = vmatmul.msk.bf16.gmra.mxu1 %vm1007_vm2, %v2565_v3  ;;  %2151 = vst.msk [vmem:[%s3370_s22 + $0x74] sm:$0xf] %vm2121_vm3, %v2022_v63  ;;  %v1292_v6 = vadd.f32 %v3696_v27, %v1291_v4  ;;  %2971 = vmatmul.msk.bf16.gmra.mxu3 %vm1007_vm2, %v2829_v13  ;;  %v1778_v34 = vadd.f32 %v3720_v42, %v1449_v19  ;;  %v3100_v63 = vld [vmem:[%s3238_s27 + $0x3b4] sm:$0xf]  ;;  %v2568_v4 = vld [vmem:[%s3238_s27 + $0x190] sm:$0xf] }
 0x19b   : > { %v2581_v19 = vor.u32 %v3034_v59, %v2578_v22 }
 0x19c   : > { %v1621_v2 = vadd.f32 %v1620_v16, %v1292_v6  ;;  %1330 = vmatmul.bf16.gmra.mxu0 %v2553_v21  ;;  %v1958_v55 = vmax.f32 %v1778_v34, 0.0  ;;  %1490 = vmatmul.bf16.gmra.mxu2 %v2809_v5  ;;  %v3033_v5 = vld [vmem:[%s3238_s27 + $0x194] sm:$0xf0] }
 0x19d   : > { %v3789_v9 = vpop.f32.mrf.mxu3 }
 0x19e   : > { %v1895_v10 = vmax.f32 %v1621_v2, 0.0  ;;  %v2086_v37 = vpack.c.bf16 %v1958_v55, %v1958_v55  ;;  %v2824_v55 = vld [vmem:[%s3238_s27 + $0x390] sm:$0xf] }
 0x19f   : > { %v1627_v32 = vpop.f32.mrf.mxu1  ;;  %v1451_v17 = vpop.f32.mrf.mxu2 }
 0x1a0   : > { %v2023_v14 = vpack.c.bf16 %v1895_v10, %v1895_v10  ;;  %2215 = vst.msk [vmem:[%s3370_s22 + $0x174] sm:$0xf] %vm2121_vm3, %v2086_v37  ;;  %v1452_v42 = vadd.f32 %v3696_v27, %v1451_v17  ;;  %v3097_v10 = vld [vmem:[%s3238_s27 + $0x394] sm:$0xf0]  ;;  %v2845_v37 = vor.u32 %v3100_v63, %v2842_v25 }
 0x1a1   : > { %v1293_v0 = vpop.f32.mrf.mxu0 }
 0x1a2   : > { %2152 = vst.msk [vmem:[%s3370_s22 + $0x78] sm:$0xf] %vm2121_vm3, %v2023_v14  ;;  %v1294_v16 = vadd.f32 %v3696_v27, %v1293_v0  ;;  %v1781_v39 = vadd.f32 %v3733_v60, %v1452_v42  ;;  %v2561_v60 = vor.u32 %v3031_v30, %v2560_v28 }
 0x1a4   : > { %v1623_v23 = vadd.f32 %v1622_v57, %v1294_v16  ;;  %v1959_v46 = vmax.f32 %v1781_v39, 0.0  ;;  %v2825_v16 = vor.u32 %v3097_v10, %v2824_v55  ;;  %v3038_v55 = vld [vmem:[%s3238_s27 + $0x1c4] sm:$0xf]  ;;  %v2594_v10 = vld [vmem:[%s3238_s27 + $0x1c8] sm:$0xf0] }
 0x1a5   : > { %v3804_v31 = vpop.f32.mrf.mxu3 }
 0x1a6   : > { %v1896_v58 = vmax.f32 %v1623_v23, 0.0  ;;  %v2087_v38 = vpack.c.bf16 %v1959_v46, %v1959_v46 }
 0x1a7   : > { %v1630_v29 = vpop.f32.mrf.mxu1  ;;  %v1453_v1 = vpop.f32.mrf.mxu2 }
 0x1a8   : > { %v2024_v40 = vpack.c.bf16 %v1896_v58, %v1896_v58  ;;  %2216 = vst.msk [vmem:[%s3370_s22 + $0x178] sm:$0xf] %vm2121_vm3, %v2087_v38  ;;  %v1454_v57 = vadd.f32 %v3696_v27, %v1453_v1  ;;  %v2850_v1 = vld [vmem:[%s3238_s27 + $0x3c8] sm:$0xf0] }
 0x1a9   : > { %v1296_v44 = vpop.f32.mrf.mxu0 }
 0x1aa   : > { %2939 = vmatmul.msk.bf16.gmra.mxu1 %vm1007_vm2, %v2573_v43  ;;  %2153 = vst.msk [vmem:[%s3370_s22 + $0x7c] sm:$0xf] %vm2121_vm3, %v2024_v40  ;;  %v1297_v45 = vadd.f32 %v3696_v27, %v1296_v44  ;;  %2972 = vmatmul.msk.bf16.gmra.mxu3 %vm1007_vm2, %v2837_v51  ;;  %v1783_v8 = vadd.f32 %v3748_v18, %v1454_v57  ;;  %v3102_v40 = vld [vmem:[%s3238_s27 + $0x3c4] sm:$0xf]  ;;  %v2576_v44 = vld [vmem:[%s3238_s27 + $0x1a0] sm:$0xf] }
 0x1ab   : > { %v2589_v57 = vor.u32 %v3036_v35, %v2586_v61 }
 0x1ac   : > { %v1626_v11 = vadd.f32 %v1625_v53, %v1297_v45  ;;  %1335 = vmatmul.bf16.gmra.mxu0 %v2561_v60  ;;  %v1960_v48 = vmax.f32 %v1783_v8, 0.0  ;;  %1495 = vmatmul.bf16.gmra.mxu2 %v2817_v41  ;;  %v3035_v41 = vld [vmem:[%s3238_s27 + $0x1a4] sm:$0xf0] }
 0x1ad   : > { %v3817_v49 = vpop.f32.mrf.mxu3 }
 0x1ae   : > { %v1897_v12 = vmax.f32 %v1626_v11, 0.0  ;;  %v2088_v3 = vpack.c.bf16 %v1960_v48, %v1960_v48  ;;  %v2832_v48 = vld [vmem:[%s3238_s27 + $0x3a0] sm:$0xf] }
 0x1af   : > { %v1632_v7 = vpop.f32.mrf.mxu1  ;;  %v1456_v54 = vpop.f32.mrf.mxu2 }
 0x1b0   : > { %v2025_v52 = vpack.c.bf16 %v1897_v12, %v1897_v12  ;;  %2217 = vst.msk [vmem:[%s3370_s22 + $0x17c] sm:$0xf] %vm2121_vm3, %v2088_v3  ;;  %v1457_v18 = vadd.f32 %v3696_v27, %v1456_v54  ;;  %v3099_v12 = vld [vmem:[%s3238_s27 + $0x3a4] sm:$0xf0]  ;;  %v2853_v3 = vor.u32 %v3102_v40, %v2850_v1 }
 0x1b1   : > { %v1298_v26 = vpop.f32.mrf.mxu0 }
 0x1b2   : > { %2154 = vst.msk [vmem:[%s3370_s22 + $0x80] sm:$0xf] %vm2121_vm3, %v2025_v52  ;;  %v1299_v53 = vadd.f32 %v3696_v27, %v1298_v26  ;;  %v1786_v13 = vadd.f32 %v3761_v36, %v1457_v18  ;;  %v2569_v36 = vor.u32 %v3033_v5, %v2568_v4 }
 0x1b4   : > { %v1628_v62 = vadd.f32 %v1627_v32, %v1299_v53  ;;  %v1961_v21 = vmax.f32 %v1786_v13, 0.0  ;;  %v2833_v53 = vor.u32 %v3099_v12, %v2832_v48  ;;  %v3040_v48 = vld [vmem:[%s3238_s27 + $0x1d4] sm:$0xf]  ;;  %v2602_v12 = vld [vmem:[%s3238_s27 + $0x1d8] sm:$0xf0] }
 0x1b5   : > { %v3832_v6 = vpop.f32.mrf.mxu3 }
 0x1b6   : > { %v1898_v34 = vmax.f32 %v1628_v62, 0.0  ;;  %v2089_v14 = vpack.c.bf16 %v1961_v21, %v1961_v21 }
 0x1b7   : > { %v1635_v2 = vpop.f32.mrf.mxu1  ;;  %v1458_v42 = vpop.f32.mrf.mxu2 }
 0x1b8   : > { %v2026_v17 = vpack.c.bf16 %v1898_v34, %v1898_v34  ;;  %2218 = vst.msk [vmem:[%s3370_s22 + $0x180] sm:$0xf] %vm2121_vm3, %v2089_v14  ;;  %v1459_v32 = vadd.f32 %v3696_v27, %v1458_v42  ;;  %v2858_v42 = vld [vmem:[%s3238_s27 + $0x3d8] sm:$0xf0] }
 0x1b9   : > { %v1301_v0 = vpop.f32.mrf.mxu0 }
 0x1ba   : > { %2940 = vmatmul.msk.bf16.gmra.mxu1 %vm1007_vm2, %v2581_v19  ;;  %2155 = vst.msk [vmem:[%s3370_s22 + $0x84] sm:$0xf] %vm2121_vm3, %v2026_v17  ;;  %v1302_v20 = vadd.f32 %v3696_v27, %v1301_v0  ;;  %2973 = vmatmul.msk.bf16.gmra.mxu3 %vm1007_vm2, %v2845_v37  ;;  %v1788_v47 = vadd.f32 %v3776_v56, %v1459_v32  ;;  %v3104_v17 = vld [vmem:[%s3238_s27 + $0x3d4] sm:$0xf]  ;;  %v2584_v0 = vld [vmem:[%s3238_s27 + $0x1b0] sm:$0xf] }
 0x1bb   : > { %v2597_v32 = vor.u32 %v3038_v55, %v2594_v10 }
 0x1bc   : > { %v1631_v39 = vadd.f32 %v1630_v29, %v1302_v20  ;;  %1340 = vmatmul.bf16.gmra.mxu0 %v2569_v36  ;;  %v1962_v23 = vmax.f32 %v1788_v47, 0.0  ;;  %1500 = vmatmul.bf16.gmra.mxu2 %v2825_v16  ;;  %v3037_v16 = vld [vmem:[%s3238_s27 + $0x1b4] sm:$0xf0] }
 0x1bd   : > { %v3845_v24 = vpop.f32.mrf.mxu3 }
 0x1be   : > { %v1899_v50 = vmax.f32 %v1631_v39, 0.0  ;;  %v2090_v43 = vpack.c.bf16 %v1962_v23, %v1962_v23  ;;  %v2840_v23 = vld [vmem:[%s3238_s27 + $0x3b0] sm:$0xf] }
 0x1bf   : > { %v1637_v46 = vpop.f32.mrf.mxu1  ;;  %v1461_v30 = vpop.f32.mrf.mxu2 }
 0x1c0   : > { %v2027_v28 = vpack.c.bf16 %v1899_v50, %v1899_v50  ;;  %2219 = vst.msk [vmem:[%s3370_s22 + $0x184] sm:$0xf] %vm2121_vm3, %v2090_v43  ;;  %v1462_v56 = vadd.f32 %v3696_v27, %v1461_v30  ;;  %v3101_v50 = vld [vmem:[%s3238_s27 + $0x3b4] sm:$0xf0]  ;;  %v2861_v43 = vor.u32 %v3104_v17, %v2858_v42 }
 0x1c1   : > { %v1303_v58 = vpop.f32.mrf.mxu0 }
 0x1c2   : > { %2156 = vst.msk [vmem:[%s3370_s22 + $0x88] sm:$0xf] %vm2121_vm3, %v2027_v28  ;;  %v1304_v29 = vadd.f32 %v3696_v27, %v1303_v58  ;;  %v1791_v51 = vadd.f32 %v3789_v9, %v1462_v56  ;;  %v2577_v9 = vor.u32 %v3035_v41, %v2576_v44 }
 0x1c4   : > { %v1633_v38 = vadd.f32 %v1632_v7, %v1304_v29  ;;  %v1963_v60 = vmax.f32 %v1791_v51, 0.0  ;;  %v2841_v29 = vor.u32 %v3101_v50, %v2840_v23  ;;  %v3042_v23 = vld [vmem:[%s3238_s27 + $0x1e4] sm:$0xf]  ;;  %v2610_v50 = vld [vmem:[%s3238_s27 + $0x1e8] sm:$0xf0] }
 0x1c5   : > { %v3860_v45 = vpop.f32.mrf.mxu3 }
 0x1c6   : > { %v1900_v8 = vmax.f32 %v1633_v38, 0.0  ;;  %v2091_v52 = vpack.c.bf16 %v1963_v60, %v1963_v60 }
 0x1c7   : > { %v1640_v11 = vpop.f32.mrf.mxu1  ;;  %v1463_v18 = vpop.f32.mrf.mxu2 }
 0x1c8   : > { %v2028_v54 = vpack.c.bf16 %v1900_v8, %v1900_v8  ;;  %2220 = vst.msk [vmem:[%s3370_s22 + $0x188] sm:$0xf] %vm2121_vm3, %v2091_v52  ;;  %v1464_v7 = vadd.f32 %v3696_v27, %v1463_v18  ;;  %v2866_v18 = vld [vmem:[%s3238_s27 + $0x3e8] sm:$0xf0] }
 0x1c9   : > { %v1306_v26 = vpop.f32.mrf.mxu0 }
 0x1ca   : > { %2941 = vmatmul.msk.bf16.gmra.mxu1 %vm1007_vm2, %v2589_v57  ;;  %2157 = vst.msk [vmem:[%s3370_s22 + $0x8c] sm:$0xf] %vm2121_vm3, %v2028_v54  ;;  %v1307_v59 = vadd.f32 %v3696_v27, %v1306_v26  ;;  %2974 = vmatmul.msk.bf16.gmra.mxu3 %vm1007_vm2, %v2853_v3  ;;  %v1793_v22 = vadd.f32 %v3804_v31, %v1464_v7  ;;  %v3106_v54 = vld [vmem:[%s3238_s27 + $0x3e4] sm:$0xf]  ;;  %v2592_v26 = vld [vmem:[%s3238_s27 + $0x1c0] sm:$0xf] }
 0x1cb   : > { %v2605_v7 = vor.u32 %v3040_v48, %v2602_v12 }
 0x1cc   : > { %v1636_v13 = vadd.f32 %v1635_v2, %v1307_v59  ;;  %1345 = vmatmul.bf16.gmra.mxu0 %v2577_v9  ;;  %v1964_v62 = vmax.f32 %v1793_v22, 0.0  ;;  %1505 = vmatmul.bf16.gmra.mxu2 %v2833_v53  ;;  %v3039_v53 = vld [vmem:[%s3238_s27 + $0x1c4] sm:$0xf0] }
 0x1cd   : > { %v3873_v63 = vpop.f32.mrf.mxu3 }
 0x1ce   : > { %v1901_v25 = vmax.f32 %v1636_v13, 0.0  ;;  %v2092_v19 = vpack.c.bf16 %v1964_v62, %v1964_v62  ;;  %v2848_v62 = vld [vmem:[%s3238_s27 + $0x3c0] sm:$0xf] }
 0x1cf   : > { %v1642_v21 = vpop.f32.mrf.mxu1  ;;  %v1466_v5 = vpop.f32.mrf.mxu2 }
 0x1d0   : > { %v2029_v4 = vpack.c.bf16 %v1901_v25, %v1901_v25  ;;  %2221 = vst.msk [vmem:[%s3370_s22 + $0x18c] sm:$0xf] %vm2121_vm3, %v2092_v19  ;;  %v1467_v31 = vadd.f32 %v3696_v27, %v1466_v5  ;;  %v3103_v25 = vld [vmem:[%s3238_s27 + $0x3c4] sm:$0xf0]  ;;  %v2869_v19 = vor.u32 %v3106_v54, %v2866_v18 }
 0x1d1   : > { %v1308_v34 = vpop.f32.mrf.mxu0 }
 0x1d2   : > { %2158 = vst.msk [vmem:[%s3370_s22 + $0x90] sm:$0xf] %vm2121_vm3, %v2029_v4  ;;  %v1309_v2 = vadd.f32 %v3696_v27, %v1308_v34  ;;  %v1796_v37 = vadd.f32 %v3817_v49, %v1467_v31  ;;  %v2585_v49 = vor.u32 %v3037_v16, %v2584_v0 }
 0x1d4   : > { %v1638_v14 = vadd.f32 %v1637_v46, %v1309_v2  ;;  %v1965_v36 = vmax.f32 %v1796_v37, 0.0  ;;  %v2849_v2 = vor.u32 %v3103_v25, %v2848_v62  ;;  %v3044_v62 = vld [vmem:[%s3238_s27 + $0x1f4] sm:$0xf]  ;;  %v2618_v25 = vld [vmem:[%s3238_s27 + $0x1f8] sm:$0xf0] }
 0x1d5   : > { %v3888_v20 = vpop.f32.mrf.mxu3 }
 0x1d6   : > { %v1902_v47 = vmax.f32 %v1638_v14, 0.0  ;;  %v2093_v28 = vpack.c.bf16 %v1965_v36, %v1965_v36 }
 0x1d7   : > { %v1645_v39 = vpop.f32.mrf.mxu1  ;;  %v1468_v56 = vpop.f32.mrf.mxu2 }
 0x1d8   : > { %v2030_v30 = vpack.c.bf16 %v1902_v47, %v1902_v47  ;;  %2222 = vst.msk [vmem:[%s3370_s22 + $0x190] sm:$0xf] %vm2121_vm3, %v2093_v28  ;;  %v1469_v46 = vadd.f32 %v3696_v27, %v1468_v56  ;;  %v2874_v56 = vld [vmem:[%s3238_s27 + $0x3f8] sm:$0xf0] }
 0x1d9   : > { %v1311_v58 = vpop.f32.mrf.mxu0 }
 0x1da   : > { %2942 = vmatmul.msk.bf16.gmra.mxu1 %vm1007_vm2, %v2597_v32  ;;  %2159 = vst.msk [vmem:[%s3370_s22 + $0x94] sm:$0xf] %vm2121_vm3, %v2030_v30  ;;  %v1312_v35 = vadd.f32 %v3696_v27, %v1311_v58  ;;  %2975 = vmatmul.msk.bf16.gmra.mxu3 %vm1007_vm2, %v2861_v43  ;;  %v1798_v61 = vadd.f32 %v3832_v6, %v1469_v46  ;;  %v3108_v30 = vld [vmem:[%s3238_s27 + $0x3f4] sm:$0xf]  ;;  %v2600_v58 = vld [vmem:[%s3238_s27 + $0x1d0] sm:$0xf] }
 0x1db   : > { %v2613_v46 = vor.u32 %v3042_v23, %v2610_v50 }
 0x1dc   : > { %v1641_v51 = vadd.f32 %v1640_v11, %v1312_v35  ;;  %1350 = vmatmul.bf16.gmra.mxu0 %v2585_v49  ;;  %v1966_v38 = vmax.f32 %v1798_v61, 0.0  ;;  %1510 = vmatmul.bf16.gmra.mxu2 %v2841_v29  ;;  %v3041_v29 = vld [vmem:[%s3238_s27 + $0x1d4] sm:$0xf0] }
 0x1dd   : > { %v3901_v40 = vpop.f32.mrf.mxu3 }
 0x1de   : > { %v1903_v1 = vmax.f32 %v1641_v51, 0.0  ;;  %v2094_v57 = vpack.c.bf16 %v1966_v38, %v1966_v38  ;;  %v2856_v51 = vld [vmem:[%s3238_s27 + $0x3d0] sm:$0xf]  ;;  %v3105_v38 = vld [vmem:[%s3238_s27 + $0x3d4] sm:$0xf0] }
 0x1df   : > { %v1647_v60 = vpop.f32.mrf.mxu1  ;;  %v1471_v41 = vpop.f32.mrf.mxu2 }
 0x1e0   : > { %v2031_v44 = vpack.c.bf16 %v1903_v1, %v1903_v1  ;;  %2223 = vst.msk [vmem:[%s3370_s22 + $0x194] sm:$0xf] %vm2121_vm3, %v2094_v57  ;;  %v1472_v6 = vadd.f32 %v3696_v27, %v1471_v41  ;;  %v2877_v57 = vor.u32 %v3108_v30, %v2874_v56 }
 0x1e1   : > { %v1313_v8 = vpop.f32.mrf.mxu0 }
 0x1e2   : > { %2160 = vst.msk [vmem:[%s3370_s22 + $0x98] sm:$0xf] %vm2121_vm3, %v2031_v44  ;;  %v1314_v11 = vadd.f32 %v3696_v27, %v1313_v8  ;;  %v1801_v3 = vadd.f32 %v3845_v24, %v1472_v6  ;;  %v2593_v24 = vor.u32 %v3039_v53, %v2592_v26 }
 0x1e4   : > { %v1643_v52 = vadd.f32 %v1642_v21, %v1314_v11  ;;  %v1967_v9 = vmax.f32 %v1801_v3, 0.0  ;;  %v2857_v11 = vor.u32 %v3105_v38, %v2856_v51 }
 0x1e5   : > { %v3916_v59 = vpop.f32.mrf.mxu3 }
 0x1e6   : > { %v1904_v22 = vmax.f32 %v1643_v52, 0.0  ;;  %v2095_v4 = vpack.c.bf16 %v1967_v9, %v1967_v9 }
 0x1e7   : > { %v1650_v13 = vpop.f32.mrf.mxu1  ;;  %v1473_v31 = vpop.f32.mrf.mxu2 }
 0x1e8   : > { %v2032_v5 = vpack.c.bf16 %v1904_v22, %v1904_v22  ;;  %2224 = vst.msk [vmem:[%s3370_s22 + $0x198] sm:$0xf] %vm2121_vm3, %v2095_v4  ;;  %v1474_v21 = vadd.f32 %v3696_v27, %v1473_v31  ;;  %v2621_v31 = vor.u32 %v3044_v62, %v2618_v25 }
 0x1e9   : > { %v1316_v34 = vpop.f32.mrf.mxu0 }
 0x1ea   : > { %2943 = vmatmul.msk.bf16.gmra.mxu1 %vm1007_vm2, %v2605_v7  ;;  %2161 = vst.msk [vmem:[%s3370_s22 + $0x9c] sm:$0xf] %vm2121_vm3, %v2032_v5  ;;  %v1317_v55 = vadd.f32 %v3696_v27, %v1316_v34  ;;  %2976 = vmatmul.msk.bf16.gmra.mxu3 %vm1007_vm2, %v2869_v19  ;;  %v1803_v10 = vadd.f32 %v3860_v45, %v1474_v21  ;;  %v3043_v21 = vld [vmem:[%s3238_s27 + $0x1e4] sm:$0xf0] }
 0x1ec   : > { %v1646_v37 = vadd.f32 %v1645_v39, %v1317_v55  ;;  %1355 = vmatmul.bf16.gmra.mxu0 %v2593_v24  ;;  %v1968_v14 = vmax.f32 %v1803_v10, 0.0  ;;  %1515 = vmatmul.bf16.gmra.mxu2 %v2849_v2  ;;  %v2608_v24 = vld [vmem:[%s3238_s27 + $0x1e0] sm:$0xf]  ;;  %v3107_v10 = vld [vmem:[%s3238_s27 + $0x3e4] sm:$0xf0] }
 0x1ed   : > { %v3929_v17 = vpop.f32.mrf.mxu3  ;;  %v2864_v55 = vld [vmem:[%s3238_s27 + $0x3e0] sm:$0xf] }
 0x1ee   : > { %v1905_v42 = vmax.f32 %v1646_v37, 0.0  ;;  %v2096_v32 = vpack.c.bf16 %v1968_v14, %v1968_v14 }
 0x1ef   : > { %v1652_v36 = vpop.f32.mrf.mxu1  ;;  %v1476_v16 = vpop.f32.mrf.mxu2 }
 0x1f0   : > { %v2033_v0 = vpack.c.bf16 %v1905_v42, %v1905_v42  ;;  %2225 = vst.msk [vmem:[%s3370_s22 + $0x19c] sm:$0xf] %vm2121_vm3, %v2096_v32  ;;  %v1477_v45 = vadd.f32 %v3696_v27, %v1476_v16  ;;  %v2609_v32 = vor.u32 %v3043_v21, %v2608_v24 }
 0x1f1   : > { %v1318_v47 = vpop.f32.mrf.mxu0 }
 0x1f2   : > { %2162 = vst.msk [vmem:[%s3370_s22 + $0xa0] sm:$0xf] %vm2121_vm3, %v2033_v0  ;;  %v1319_v39 = vadd.f32 %v3696_v27, %v1318_v47  ;;  %v1806_v43 = vadd.f32 %v3873_v63, %v1477_v45  ;;  %v2601_v63 = vor.u32 %v3041_v29, %v2600_v58  ;;  %v3046_v58 = vld [vmem:[%s3238_s27 + $0x204] sm:$0xf]  ;;  %v2626_v29 = vld [vmem:[%s3238_s27 + $0x208] sm:$0xf0] }
 0x1f4   : > { %v1648_v28 = vadd.f32 %v1647_v60, %v1319_v39  ;;  %v1969_v49 = vmax.f32 %v1806_v43, 0.0 }
 0x1f5   : > { %v3946_v1 = vpop.f32.mrf.mxu3 }
 0x1f6   : > { %v1906_v35 = vmax.f32 %v1648_v28, 0.0  ;;  %v2097_v44 = vpack.c.bf16 %v1969_v49, %v1969_v49 }
 0x1f7   : > { %v1655_v61 = vpop.f32.mrf.mxu1  ;;  %v1478_v6 = vpop.f32.mrf.mxu2 }
 0x1f8   : > { %v2034_v41 = vpack.c.bf16 %v1906_v35, %v1906_v35  ;;  %2226 = vst.msk [vmem:[%s3370_s22 + $0x1a0] sm:$0xf] %vm2121_vm3, %v2097_v44  ;;  %v1479_v60 = vadd.f32 %v3696_v27, %v1478_v6  ;;  %v2616_v44 = vld [vmem:[%s3238_s27 + $0x1f0] sm:$0xf] }
 0x1f9   : > { %v1321_v8 = vpop.f32.mrf.mxu0 }
 0x1fa   : > { %2944 = vmatmul.msk.bf16.gmra.mxu1 %vm1007_vm2, %v2613_v46  ;;  %2163 = vst.msk [vmem:[%s3370_s22 + $0xa4] sm:$0xf] %vm2121_vm3, %v2034_v41  ;;  %v1322_v48 = vadd.f32 %v3696_v27, %v1321_v8  ;;  %2977 = vmatmul.msk.bf16.gmra.mxu3 %vm1007_vm2, %v2877_v57  ;;  %v1808_v12 = vadd.f32 %v3888_v20, %v1479_v60  ;;  %v3045_v41 = vld [vmem:[%s3238_s27 + $0x1f4] sm:$0xf0]  ;;  %v2872_v60 = vld [vmem:[%s3238_s27 + $0x3f0] sm:$0xf] }
 0x1fb   : > { %v2629_v57 = vor.u32 %v3046_v58, %v2626_v29  ;;  %v3109_v8 = vld [vmem:[%s3238_s27 + $0x3f4] sm:$0xf0] }
 0x1fc   : > { %v1651_v3 = vadd.f32 %v1650_v13, %v1322_v48  ;;  %1360 = vmatmul.bf16.gmra.mxu0 %v2601_v63  ;;  %v1970_v52 = vmax.f32 %v1808_v12, 0.0  ;;  %1520 = vmatmul.bf16.gmra.mxu2 %v2857_v11 }
 0x1fd   : > { %v3957_v53 = vpop.f32.mrf.mxu3 }
 0x1fe   : > { %v1907_v54 = vmax.f32 %v1651_v3, 0.0  ;;  %v2098_v9 = vpack.c.bf16 %v1970_v52, %v1970_v52  ;;  %v2617_v3 = vor.u32 %v3045_v41, %v2616_v44 }
 0x1ff   : > { %v1657_v18 = vpop.f32.mrf.mxu1  ;;  %v1481_v26 = vpop.f32.mrf.mxu2 }
 0x200   : > { %v2035_v7 = vpack.c.bf16 %v1907_v54, %v1907_v54  ;;  %2227 = vst.msk [vmem:[%s3370_s22 + $0x1a4] sm:$0xf] %vm2121_vm3, %v2098_v9  ;;  %v1482_v20 = vadd.f32 %v3696_v27, %v1481_v26  ;;  %v2873_v54 = vor.u32 %v3109_v8, %v2872_v60 }
 0x201   : > { %v1323_v22 = vpop.f32.mrf.mxu0 }
 0x202   : > { %2164 = vst.msk [vmem:[%s3370_s22 + $0xa8] sm:$0xf] %vm2121_vm3, %v2035_v7  ;;  %v1324_v13 = vadd.f32 %v3696_v27, %v1323_v22  ;;  %v1811_v19 = vadd.f32 %v3901_v40, %v1482_v20 }
 0x204   : > { %v1653_v4 = vadd.f32 %v1652_v36, %v1324_v13  ;;  %v1971_v5 = vmax.f32 %v1811_v19, 0.0  ;;  %v2865_v36 = vor.u32 %v3107_v10, %v2864_v55 }
 0x205   : > { %v3979_v45 = vpop.f32.mrf.mxu3 }
 0x206   : > { %v1908_v34 = vmax.f32 %v1653_v4, 0.0  ;;  %v2099_v37 = vpack.c.bf16 %v1971_v5, %v1971_v5 }
 0x207   : > { %v1660_v2 = vpop.f32.mrf.mxu1  ;;  %v1483_v42 = vpop.f32.mrf.mxu2 }
 0x208   : > { %v2036_v14 = vpack.c.bf16 %v1908_v34, %v1908_v34  ;;  %2228 = vst.msk [vmem:[%s3370_s22 + $0x1a8] sm:$0xf] %vm2121_vm3, %v2099_v37  ;;  %v1484_v0 = vadd.f32 %v3696_v27, %v1483_v42 }
 0x209   : > { %v1326_v40 = vpop.f32.mrf.mxu0 }
 0x20a   : > { %2945 = vmatmul.msk.bf16.gmra.mxu1 %vm1007_vm2, %v2621_v31  ;;  %2165 = vst.msk [vmem:[%s3370_s22 + $0xac] sm:$0xf] %vm2121_vm3, %v2036_v14  ;;  %v1327_v16 = vadd.f32 %v3696_v27, %v1326_v40  ;;  %v1813_v47 = vadd.f32 %v3916_v59, %v1484_v0 }
 0x20c   : > { %v1656_v39 = vadd.f32 %v1655_v61, %v1327_v16  ;;  %1365 = vmatmul.bf16.gmra.mxu0 %v2609_v32  ;;  %v1972_v23 = vmax.f32 %v1813_v47, 0.0  ;;  %1525 = vmatmul.bf16.gmra.mxu2 %v2865_v36 }
 0x20d   : > { %v3991_v51 = vpop.f32.mrf.mxu3 }
 0x20e   : > { %v1909_v50 = vmax.f32 %v1656_v39, 0.0  ;;  %v2100_v28 = vpack.c.bf16 %v1972_v23, %v1972_v23 }
 0x20f   : > { %v1662_v43 = vpop.f32.mrf.mxu1  ;;  %v1486_v56 = vpop.f32.mrf.mxu2 }
 0x210   : > { %v2037_v30 = vpack.c.bf16 %v1909_v50, %v1909_v50  ;;  %2229 = vst.msk [vmem:[%s3370_s22 + $0x1ac] sm:$0xf] %vm2121_vm3, %v2100_v28  ;;  %v1487_v49 = vadd.f32 %v3696_v27, %v1486_v56 }
 0x211   : > { %v1328_v46 = vpop.f32.mrf.mxu0 }
 0x212   : > { %2166 = vst.msk [vmem:[%s3370_s22 + $0xb0] sm:$0xf] %vm2121_vm3, %v2037_v30  ;;  %v1329_v59 = vadd.f32 %v3696_v27, %v1328_v46  ;;  %v1816_v35 = vadd.f32 %v3929_v17, %v1487_v49 }
 0x214   : > { %v1658_v61 = vadd.f32 %v1657_v18, %v1329_v59  ;;  %v1973_v38 = vmax.f32 %v1816_v35, 0.0 }
 0x215   : > { %v1827_v13 = vpop.f32.mrf.mxu3 }
 0x216   : > { %v1910_v6 = vmax.f32 %v1658_v61, 0.0  ;;  %v2101_v11 = vpack.c.bf16 %v1973_v38, %v1973_v38 }
 0x217   : > { %v1665_v63 = vpop.f32.mrf.mxu1  ;;  %v1488_v12 = vpop.f32.mrf.mxu2 }
 0x218   : > { %v2038_v48 = vpack.c.bf16 %v1910_v6, %v1910_v6  ;;  %2230 = vst.msk [vmem:[%s3370_s22 + $0x1b0] sm:$0xf] %vm2121_vm3, %v2101_v11  ;;  %v1489_v17 = vadd.f32 %v3696_v27, %v1488_v12 }
 0x219   : > { %v1331_v52 = vpop.f32.mrf.mxu0 }
 0x21a   : > { %2946 = vmatmul.msk.bf16.gmra.mxu1 %vm1007_vm2, %v2629_v57  ;;  %2167 = vst.msk [vmem:[%s3370_s22 + $0xb4] sm:$0xf] %vm2121_vm3, %v2038_v48  ;;  %v1332_v18 = vadd.f32 %v3696_v27, %v1331_v52  ;;  %v1818_v9 = vadd.f32 %v3946_v1, %v1489_v17 }
 0x21c   : > { %v1661_v7 = vadd.f32 %v1660_v2, %v1332_v18  ;;  %1370 = vmatmul.bf16.gmra.mxu0 %v2617_v3  ;;  %v1974_v26 = vmax.f32 %v1818_v9, 0.0  ;;  %1530 = vmatmul.bf16.gmra.mxu2 %v2873_v54 }
 0x21d   : > { %v1830_v14 = vpop.f32.mrf.mxu3 }
 0x21e   : > { %v1911_v20 = vmax.f32 %v1661_v7, 0.0  ;;  %v2102_v62 = vpack.c.bf16 %v1974_v26, %v1974_v26 }
 0x21f   : > { %v1667_v22 = vpop.f32.mrf.mxu1  ;;  %v1491_v19 = vpop.f32.mrf.mxu2 }
 0x220   : > { %v2039_v25 = vpack.c.bf16 %v1911_v20, %v1911_v20  ;;  %2231 = vst.msk [vmem:[%s3370_s22 + $0x1b4] sm:$0xf] %vm2121_vm3, %v2102_v62  ;;  %v1492_v4 = vadd.f32 %v3696_v27, %v1491_v19 }
 0x221   : > { %v1333_v5 = vpop.f32.mrf.mxu0 }
 0x222   : > { %2168 = vst.msk [vmem:[%s3370_s22 + $0xb8] sm:$0xf] %vm2121_vm3, %v2039_v25  ;;  %v1334_v1 = vadd.f32 %v3696_v27, %v1333_v5  ;;  %v1821_v31 = vadd.f32 %v3957_v53, %v1492_v4 }
 0x224   : > { %v1663_v24 = vadd.f32 %v1662_v43, %v1334_v1  ;;  %v1975_v21 = vmax.f32 %v1821_v31, 0.0  ;;  %v4024_v43 = vld [vmem:[%s4141_s2] ss:$0 sm:$0xff] }
 0x225   : > { %v1832_v30 = vpop.f32.mrf.mxu3 }
 0x226   : > { %v1912_v34 = vmax.f32 %v1663_v24, 0.0  ;;  %v2103_v55 = vpack.c.bf16 %v1975_v21, %v1975_v21 }
 0x227   : > { %v1670_v2 = vpop.f32.mrf.mxu1  ;;  %v1493_v37 = vpop.f32.mrf.mxu2 }
 0x228   : > { %v2040_v10 = vpack.c.bf16 %v1912_v34, %v1912_v34  ;;  %2232 = vst.msk [vmem:[%s3370_s22 + $0x1b8] sm:$0xf] %vm2121_vm3, %v2103_v55  ;;  %v1494_v42 = vadd.f32 %v3696_v27, %v1493_v37 }
 0x229   : > { %v1336_v32 = vpop.f32.mrf.mxu0 }
 0x22a   : > { %2169 = vst.msk [vmem:[%s3370_s22 + $0xbc] sm:$0xf] %vm2121_vm3, %v2040_v10  ;;  %v1337_v0 = vadd.f32 %v3696_v27, %v1336_v32  ;;  %v1823_v53 = vadd.f32 %v3979_v45, %v1494_v42 }
 0x22c   : > { %v1666_v40 = vadd.f32 %v1665_v63, %v1337_v0  ;;  %v1976_v36 = vmax.f32 %v1823_v53, 0.0 }
 0x22d   : > { %v1835_v6 = vpop.f32.mrf.mxu3 }
 0x22e   : > { %v1913_v16 = vmax.f32 %v1666_v40, 0.0  ;;  %v2104_v39 = vpack.c.bf16 %v1976_v36, %v1976_v36 }
 0x22f   : > { %v1672_v47 = vpop.f32.mrf.mxu1  ;;  %v1496_v50 = vpop.f32.mrf.mxu2 }
 0x230   : > { %v2041_v23 = vpack.c.bf16 %v1913_v16, %v1913_v16  ;;  %2233 = vst.msk [vmem:[%s3370_s22 + $0x1bc] sm:$0xf] %vm2121_vm3, %v2104_v39  ;;  %v1497_v28 = vadd.f32 %v4024_v43, %v1496_v50 }
 0x231   : > { %v1338_v27 = vpop.f32.mrf.mxu0 }
 0x232   : > { %2170 = vst.msk [vmem:[%s3370_s22 + $0xc0] sm:$0xf] %vm2121_vm3, %v2041_v23  ;;  %v1339_v45 = vadd.f32 %v4024_v43, %v1338_v27  ;;  %v1826_v56 = vadd.f32 %v3991_v51, %v1497_v28 }
 0x234   : > { %v1668_v49 = vadd.f32 %v1667_v22, %v1339_v45  ;;  %v1977_v46 = vmax.f32 %v1826_v56, 0.0 }
 0x235   : > { %v1837_v20 = vpop.f32.mrf.mxu3 }
 0x236   : > { %v1914_v59 = vmax.f32 %v1668_v49, 0.0  ;;  %v2105_v29 = vpack.c.bf16 %v1977_v46, %v1977_v46 }
 0x237   : > { %v1675_v58 = vpop.f32.mrf.mxu1  ;;  %v1498_v61 = vpop.f32.mrf.mxu2 }
 0x238   : > { %v2042_v35 = vpack.c.bf16 %v1914_v59, %v1914_v59  ;;  %2234 = vst.msk [vmem:[%s3370_s22 + $0x1c0] sm:$0xf] %vm2121_vm3, %v2105_v29  ;;  %v1499_v38 = vadd.f32 %v4024_v43, %v1498_v61 }
 0x239   : > { %v1341_v57 = vpop.f32.mrf.mxu0 }
 0x23a   : > { %2171 = vst.msk [vmem:[%s3370_s22 + $0xc4] sm:$0xf] %vm2121_vm3, %v2042_v35  ;;  %v1342_v44 = vadd.f32 %v4024_v43, %v1341_v57  ;;  %v1828_v41 = vadd.f32 %v1827_v13, %v1499_v38 }
 0x23c   : > { %v1671_v51 = vadd.f32 %v1670_v2, %v1342_v44  ;;  %v1978_v63 = vmax.f32 %v1828_v41, 0.0 }
 0x23d   : > { %v1840_v10 = vpop.f32.mrf.mxu3 }
 0x23e   : > { %v1915_v60 = vmax.f32 %v1671_v51, 0.0  ;;  %v2106_v11 = vpack.c.bf16 %v1978_v63, %v1978_v63 }
 0x23f   : > { %v1677_v8 = vpop.f32.mrf.mxu1  ;;  %v1501_v12 = vpop.f32.mrf.mxu2 }
 0x240   : > { %v2043_v48 = vpack.c.bf16 %v1915_v60, %v1915_v60  ;;  %2235 = vst.msk [vmem:[%s3370_s22 + $0x1c4] sm:$0xf] %vm2121_vm3, %v2106_v11  ;;  %v1502_v3 = vadd.f32 %v4024_v43, %v1501_v12 }
 0x241   : > { %v1343_v17 = vpop.f32.mrf.mxu0 }
 0x242   : > { %2172 = vst.msk [vmem:[%s3370_s22 + $0xc8] sm:$0xf] %vm2121_vm3, %v2043_v48  ;;  %v1344_v52 = vadd.f32 %v4024_v43, %v1343_v17  ;;  %v1831_v54 = vadd.f32 %v1830_v14, %v1502_v3 }
 0x244   : > { %v1673_v18 = vadd.f32 %v1672_v47, %v1344_v52  ;;  %v1979_v9 = vmax.f32 %v1831_v54, 0.0 }
 0x245   : > { %v1842_v27 = vpop.f32.mrf.mxu3 }
 0x246   : > { %v1916_v7 = vmax.f32 %v1673_v18, 0.0  ;;  %v2107_v22 = vpack.c.bf16 %v1979_v9, %v1979_v9 }
 0x247   : > { %v1680_v26 = vpop.f32.mrf.mxu1  ;;  %v1503_v62 = vpop.f32.mrf.mxu2 }
 0x248   : > { %v2044_v13 = vpack.c.bf16 %v1916_v7, %v1916_v7  ;;  %2236 = vst.msk [vmem:[%s3370_s22 + $0x1c8] sm:$0xf] %vm2121_vm3, %v2107_v22  ;;  %v1504_v25 = vadd.f32 %v4024_v43, %v1503_v62 }
 0x249   : > { %v1346_v19 = vpop.f32.mrf.mxu0 }
 0x24a   : > { %2173 = vst.msk [vmem:[%s3370_s22 + $0xcc] sm:$0xf] %vm2121_vm3, %v2044_v13  ;;  %v1347_v4 = vadd.f32 %v4024_v43, %v1346_v19  ;;  %v1833_v5 = vadd.f32 %v1832_v30, %v1504_v25 }
 0x24c   : > { %v1676_v1 = vadd.f32 %v1675_v58, %v1347_v4  ;;  %v1980_v31 = vmax.f32 %v1833_v5, 0.0 }
 0x24d   : > { %v1845_v41 = vpop.f32.mrf.mxu3 }
 0x24e   : > { %v1917_v24 = vmax.f32 %v1676_v1, 0.0  ;;  %v2108_v34 = vpack.c.bf16 %v1980_v31, %v1980_v31 }
 0x24f   : > { %v1682_v21 = vpop.f32.mrf.mxu1  ;;  %v1506_v55 = vpop.f32.mrf.mxu2 }
 0x250   : > { %v2045_v2 = vpack.c.bf16 %v1917_v24, %v1917_v24  ;;  %2237 = vst.msk [vmem:[%s3370_s22 + $0x1cc] sm:$0xf] %vm2121_vm3, %v2108_v34  ;;  %v1507_v37 = vadd.f32 %v4024_v43, %v1506_v55 }
 0x251   : > { %v1348_v14 = vpop.f32.mrf.mxu0 }
 0x252   : > { %2174 = vst.msk [vmem:[%s3370_s22 + $0xd0] sm:$0xf] %vm2121_vm3, %v2045_v2  ;;  %v1349_v42 = vadd.f32 %v4024_v43, %v1348_v14  ;;  %v1836_v32 = vadd.f32 %v1835_v6, %v1507_v37 }
 0x254   : > { %v1678_v0 = vadd.f32 %v1677_v8, %v1349_v42  ;;  %v1981_v53 = vmax.f32 %v1836_v32, 0.0 }
 0x255   : > { %v1847_v7 = vpop.f32.mrf.mxu3 }
 0x256   : > { %v1918_v40 = vmax.f32 %v1678_v0, 0.0  ;;  %v2109_v16 = vpack.c.bf16 %v1981_v53, %v1981_v53 }
 0x257   : > { %v1685_v36 = vpop.f32.mrf.mxu1  ;;  %v1508_v39 = vpop.f32.mrf.mxu2 }
 0x258   : > { %v2046_v47 = vpack.c.bf16 %v1918_v40, %v1918_v40  ;;  %2238 = vst.msk [vmem:[%s3370_s22 + $0x1d0] sm:$0xf] %vm2121_vm3, %v2109_v16  ;;  %v1509_v23 = vadd.f32 %v4024_v43, %v1508_v39 }
 0x259   : > { %v1351_v50 = vpop.f32.mrf.mxu0 }
 0x25a   : > { %2175 = vst.msk [vmem:[%s3370_s22 + $0xd4] sm:$0xf] %vm2121_vm3, %v2046_v47  ;;  %v1352_v28 = vadd.f32 %v4024_v43, %v1351_v50  ;;  %v1838_v45 = vadd.f32 %v1837_v20, %v1509_v23 }
 0x25c   : > { %v1681_v30 = vadd.f32 %v1680_v26, %v1352_v28  ;;  %v1982_v56 = vmax.f32 %v1838_v45, 0.0 }
 0x25d   : > { %v1850_v2 = vpop.f32.mrf.mxu3 }
 0x25e   : > { %v1919_v49 = vmax.f32 %v1681_v30, 0.0  ;;  %v2110_v59 = vpack.c.bf16 %v1982_v56, %v1982_v56 }
 0x25f   : > { %v1687_v46 = vpop.f32.mrf.mxu1  ;;  %v1511_v29 = vpop.f32.mrf.mxu2 }
 0x260   : > { %v2047_v58 = vpack.c.bf16 %v1919_v49, %v1919_v49  ;;  %2239 = vst.msk [vmem:[%s3370_s22 + $0x1d4] sm:$0xf] %vm2121_vm3, %v2110_v59  ;;  %v1512_v35 = vadd.f32 %v4024_v43, %v1511_v29 }
 0x261   : > { %v1353_v61 = vpop.f32.mrf.mxu0 }
 0x262   : > { %2176 = vst.msk [vmem:[%s3370_s22 + $0xd8] sm:$0xf] %vm2121_vm3, %v2047_v58  ;;  %v1354_v38 = vadd.f32 %v4024_v43, %v1353_v61  ;;  %v1841_v57 = vadd.f32 %v1840_v10, %v1512_v35 }
 0x264   : > { %v1683_v44 = vadd.f32 %v1682_v21, %v1354_v38  ;;  %v1983_v51 = vmax.f32 %v1841_v57, 0.0 }
 0x265   : > { %v1852_v50 = vpop.f32.mrf.mxu3 }
 0x266   : > { %v1920_v6 = vmax.f32 %v1683_v44, 0.0  ;;  %v2111_v60 = vpack.c.bf16 %v1983_v51, %v1983_v51 }
 0x267   : > { %v1690_v63 = vpop.f32.mrf.mxu1  ;;  %v1513_v11 = vpop.f32.mrf.mxu2 }
 0x268   : > { %v2048_v8 = vpack.c.bf16 %v1920_v6, %v1920_v6  ;;  %2240 = vst.msk [vmem:[%s3370_s22 + $0x1d8] sm:$0xf] %vm2121_vm3, %v2111_v60  ;;  %v1514_v48 = vadd.f32 %v4024_v43, %v1513_v11 }
 0x269   : > { %v1356_v12 = vpop.f32.mrf.mxu0 }
 0x26a   : > { %2177 = vst.msk [vmem:[%s3370_s22 + $0xdc] sm:$0xf] %vm2121_vm3, %v2048_v8  ;;  %v1357_v3 = vadd.f32 %v4024_v43, %v1356_v12  ;;  %v1843_v17 = vadd.f32 %v1842_v27, %v1514_v48 }
 0x26c   : > { %v1686_v52 = vadd.f32 %v1685_v36, %v1357_v3  ;;  %v1984_v54 = vmax.f32 %v1843_v17, 0.0  ;;  %v1377_v17 = vadd.f32 %v4024_v43, %v3372_v15 }
 0x26d   : > { %v1855_v57 = vpop.f32.mrf.mxu3 }
 0x26e   : > { %v1921_v18 = vmax.f32 %v1686_v52, 0.0  ;;  %v2112_v26 = vpack.c.bf16 %v1984_v54, %v1984_v54 }
 0x26f   : > { %v1692_v9 = vpop.f32.mrf.mxu1  ;;  %v1516_v22 = vpop.f32.mrf.mxu2 }
 0x270   : > { %v2049_v20 = vpack.c.bf16 %v1921_v18, %v1921_v18  ;;  %2241 = vst.msk [vmem:[%s3370_s22 + $0x1dc] sm:$0xf] %vm2121_vm3, %v2112_v26  ;;  %v1517_v13 = vadd.f32 %v4024_v43, %v1516_v22 }
 0x271   : > { %v1358_v62 = vpop.f32.mrf.mxu0 }
 0x272   : > { %2178 = vst.msk [vmem:[%s3370_s22 + $0xe0] sm:$0xf] %vm2121_vm3, %v2049_v20  ;;  %v1359_v25 = vadd.f32 %v4024_v43, %v1358_v62  ;;  %v1846_v19 = vadd.f32 %v1845_v41, %v1517_v13 }
 0x274   : > { %v1688_v4 = vadd.f32 %v1687_v46, %v1359_v25  ;;  %v1985_v5 = vmax.f32 %v1846_v19, 0.0 }
 0x275   : > { %v1857_v18 = vpop.f32.mrf.mxu3 }
 0x276   : > { %v1922_v1 = vmax.f32 %v1688_v4, 0.0  ;;  %v2113_v24 = vpack.c.bf16 %v1985_v5, %v1985_v5 }
 0x277   : > { %v1695_v31 = vpop.f32.mrf.mxu1  ;;  %v1518_v34 = vpop.f32.mrf.mxu2 }
 0x278   : > { %v2050_v21 = vpack.c.bf16 %v1922_v1, %v1922_v1  ;;  %2242 = vst.msk [vmem:[%s3370_s22 + $0x1e0] sm:$0xf] %vm2121_vm3, %v2113_v24  ;;  %v1519_v55 = vadd.f32 %v4024_v43, %v1518_v34  ;;  %v1379_v1 = vadd.f32 %v4024_v43, %v3387_v33 }
 0x279   : > { %v1361_v10 = vpop.f32.mrf.mxu0 }
 0x27a   : > { %2179 = vst.msk [vmem:[%s3370_s22 + $0xe4] sm:$0xf] %vm2121_vm3, %v2050_v21  ;;  %v1362_v37 = vadd.f32 %v4024_v43, %v1361_v10  ;;  %v1848_v14 = vadd.f32 %v1847_v7, %v1519_v55 }
 0x27c   : > { %v1691_v42 = vadd.f32 %v1690_v63, %v1362_v37  ;;  %v1986_v32 = vmax.f32 %v1848_v14, 0.0 }
 0x27d   : > { %v1860_v10 = vpop.f32.mrf.mxu3 }
 0x27e   : > { %v1923_v0 = vmax.f32 %v1691_v42, 0.0  ;;  %v2114_v40 = vpack.c.bf16 %v1986_v32, %v1986_v32 }
 0x27f   : > { %v1697_v53 = vpop.f32.mrf.mxu1  ;;  %v1521_v16 = vpop.f32.mrf.mxu2 }
 0x280   : > { %v2051_v36 = vpack.c.bf16 %v1923_v0, %v1923_v0  ;;  %2243 = vst.msk [vmem:[%s3370_s22 + $0x1e4] sm:$0xf] %vm2121_vm3, %v2114_v40  ;;  %v1522_v47 = vadd.f32 %v4024_v43, %v1521_v16 }
 0x281   : > { %v1363_v39 = vpop.f32.mrf.mxu0 }
 0x282   : > { %2180 = vst.msk [vmem:[%s3370_s22 + $0xe8] sm:$0xf] %vm2121_vm3, %v2051_v36  ;;  %v1364_v23 = vadd.f32 %v4024_v43, %v1363_v39  ;;  %v1851_v28 = vadd.f32 %v1850_v2, %v1522_v47 }
 0x284   : > { %v1693_v27 = vadd.f32 %v1692_v9, %v1364_v23  ;;  %v1987_v45 = vmax.f32 %v1851_v28, 0.0 }
 0x285   : > { %v1862_v28 = vpop.f32.mrf.mxu3 }
 0x286   : > { %v1924_v30 = vmax.f32 %v1693_v27, 0.0  ;;  %v2115_v49 = vpack.c.bf16 %v1987_v45, %v1987_v45 }
 0x287   : > { %v1700_v56 = vpop.f32.mrf.mxu1  ;;  %v1523_v59 = vpop.f32.mrf.mxu2 }
 0x288   : > { %v2052_v46 = vpack.c.bf16 %v1924_v30, %v1924_v30  ;;  %2244 = vst.msk [vmem:[%s3370_s22 + $0x1e8] sm:$0xf] %vm2121_vm3, %v2115_v49  ;;  %v1524_v58 = vadd.f32 %v4024_v43, %v1523_v59 }
 0x289   : > { %v1366_v29 = vpop.f32.mrf.mxu0 }
 0x28a   : > { %2181 = vst.msk [vmem:[%s3370_s22 + $0xec] sm:$0xf] %vm2121_vm3, %v2052_v46  ;;  %v1367_v35 = vadd.f32 %v4024_v43, %v1366_v29  ;;  %v1853_v61 = vadd.f32 %v1852_v50, %v1524_v58 }
 0x28c   : > { %v1696_v38 = vadd.f32 %v1695_v31, %v1367_v35  ;;  %v1988_v44 = vmax.f32 %v1853_v61, 0.0 }
 0x28e   : > { %v1925_v41 = vmax.f32 %v1696_v38, 0.0  ;;  %v2116_v6 = vpack.c.bf16 %v1988_v44, %v1988_v44 }
 0x28f   : > { %v1702_v51 = vpop.f32.mrf.mxu1  ;;  %v1526_v60 = vpop.f32.mrf.mxu2 }
 0x290   : > { %v2053_v63 = vpack.c.bf16 %v1925_v41, %v1925_v41  ;;  %2245 = vst.msk [vmem:[%s3370_s22 + $0x1ec] sm:$0xf] %vm2121_vm3, %v2116_v6  ;;  %v1527_v8 = vadd.f32 %v4024_v43, %v1526_v60 }
 0x291   : > { %v1368_v11 = vpop.f32.mrf.mxu0 }
 0x292   : > { %2182 = vst.msk [vmem:[%s3370_s22 + $0xf0] sm:$0xf] %vm2121_vm3, %v2053_v63  ;;  %v1369_v48 = vadd.f32 %v4024_v43, %v1368_v11  ;;  %v1856_v12 = vadd.f32 %v1855_v57, %v1527_v8 }
 0x294   : > { %v1698_v3 = vadd.f32 %v1697_v53, %v1369_v48  ;;  %v1989_v52 = vmax.f32 %v1856_v12, 0.0 }
 0x296   : > { %v1926_v54 = vmax.f32 %v1698_v3, 0.0  ;;  %v2117_v7 = vpack.c.bf16 %v1989_v52, %v1989_v52 }
 0x297   : > { %v1705_v9 = vpop.f32.mrf.mxu1  ;;  %v1528_v22 = vpop.f32.mrf.mxu2 }
 0x298   : > { %v1706_v26 = vadd.f32 %v1705_v9, %v1377_v17  ;;  %v2054_v20 = vpack.c.bf16 %v1926_v54, %v1926_v54  ;;  %2246 = vst.msk [vmem:[%s3370_s22 + $0x1f0] sm:$0xf] %vm2121_vm3, %v2117_v7  ;;  %v1529_v62 = vadd.f32 %v4024_v43, %v1528_v22 }
 0x299   : > { %v1371_v25 = vpop.f32.mrf.mxu0 }
 0x29a   : > { %v1929_v13 = vmax.f32 %v1706_v26, 0.0  ;;  %2183 = vst.msk [vmem:[%s3370_s22 + $0xf4] sm:$0xf] %vm2121_vm3, %v2054_v20  ;;  %v1372_v15 = vadd.f32 %v4024_v43, %v1371_v25  ;;  %v1858_v4 = vadd.f32 %v1857_v18, %v1529_v62 }
 0x29c   : > { %v2057_v19 = vpack.c.bf16 %v1929_v13, %v1929_v13  ;;  %v1701_v5 = vadd.f32 %v1700_v56, %v1372_v15  ;;  %v1990_v31 = vmax.f32 %v1858_v4, 0.0 }
 0x29e   : > { %2186 = vst.msk [vmem:[%s3370_s22 + $0x100] sm:$0xf] %vm2121_vm3, %v2057_v19  ;;  %v1927_v24 = vmax.f32 %v1701_v5, 0.0  ;;  %v2118_v34 = vpack.c.bf16 %v1990_v31, %v1990_v31 }
 0x29f   : > { %v1707_v21 = vpop.f32.mrf.mxu1  ;;  %v1531_v37 = vpop.f32.mrf.mxu2 }
 0x2a0   : > { %v1708_v2 = vadd.f32 %v1707_v21, %v1379_v1  ;;  %v2055_v55 = vpack.c.bf16 %v1927_v24, %v1927_v24  ;;  %2247 = vst.msk [vmem:[%s3370_s22 + $0x1f4] sm:$0xf] %vm2121_vm3, %v2118_v34  ;;  %v1532_v42 = vadd.f32 %v4024_v43, %v1531_v37 }
 0x2a1   : > { %v1373_v32 = vpop.f32.mrf.mxu0 }
 0x2a2   : > { %v1930_v14 = vmax.f32 %v1708_v2, 0.0  ;;  %2184 = vst.msk [vmem:[%s3370_s22 + $0xf8] sm:$0xf] %vm2121_vm3, %v2055_v55  ;;  %v1374_v33 = vadd.f32 %v4024_v43, %v1373_v32  ;;  %v1861_v53 = vadd.f32 %v1860_v10, %v1532_v42 }
 0x2a4   : > { %v2058_v0 = vpack.c.bf16 %v1930_v14, %v1930_v14  ;;  %v1703_v40 = vadd.f32 %v1702_v51, %v1374_v33  ;;  %v1991_v36 = vmax.f32 %v1861_v53, 0.0 }
 0x2a6   : > { %2187 = vst.msk [vmem:[%s3370_s22 + $0x104] sm:$0xf] %vm2121_vm3, %v2058_v0  ;;  %v1928_v16 = vmax.f32 %v1703_v40, 0.0  ;;  %v2119_v47 = vpack.c.bf16 %v1991_v36, %v1991_v36 }
 0x2a7   : > { %v1533_v23 = vpop.f32.mrf.mxu2 }
 0x2a8   : > { %v2056_v39 = vpack.c.bf16 %v1928_v16, %v1928_v16  ;;  %2248 = vst.msk [vmem:[%s3370_s22 + $0x1f8] sm:$0xf] %vm2121_vm3, %v2119_v47  ;;  %v1534_v50 = vadd.f32 %v4024_v43, %v1533_v23 }
 0x2aa   : > { %2185 = vst.msk [vmem:[%s3370_s22 + $0xfc] sm:$0xf] %vm2121_vm3, %v2056_v39  ;;  %v1863_v27 = vadd.f32 %v1862_v28, %v1534_v50 }
 0x2ac   : > { %v1992_v45 = vmax.f32 %v1863_v27, 0.0 }
 0x2ae   : > { %v2120_v30 = vpack.c.bf16 %v1992_v45, %v1992_v45 }
 0x2b0   : > { %2249 = vst.msk [vmem:[%s3370_s22 + $0x1fc] sm:$0xf] %vm2121_vm3, %v2120_v30 }
 0x2b1 PF: > { %s13_s14 = sadd.s32 1, %s3179_s14   ;;  %s4143_s12 = smov %s3175_s13 }
 0x2b2   : > { %p10_p5 = scmp.ge.s32.totalorder %s13_s14, 4   ;;  %s4144_s13 = smov %s4146_s15 }
 0x2b4   :  { %12 = sbr.rel (!%p10_p5) target bundleno = 2 (0x2), region = 68 }

</bundles_post_ra>
